<compile_context>
chip_gen: v6e
topology: v6e:2x2x1
jax: 0.10.0
libtpu: 0.0.40
codegen_flags: <defaults>
</compile_context>

<pallas_src>
import math
import functools

import jax
import jax.numpy as jnp
from jax.experimental import pallas as pl
from jax.experimental.pallas import tpu as pltpu

# ---- model hyperparameters (small, consistent with the module) ----
SEQ = 8          # sequence length
BATCH = 2        # batch size
D_MODEL = 32     # embedding dim
N_HEAD = 4       # attention heads
D_FF = 64        # feedforward dim
N_LAYERS = 2     # TransformerEncoder num_layers
EPS = 1e-5       # LayerNorm eps
NEG_INF = -1e30  # additive mask value for cross-batch attention entries

# Row order of the packed per-layer (6, E) bias / LayerNorm table.
_BO, _G1, _BE1, _BF2, _G2, _BE2 = range(6)


def _encoder_kernel(x_ref, wqkv_ref, wo_ref, w1_ref, w2_ref, bqkv_ref,
                    bf1_ref, vec_ref, o_ref, *, n_head: int, n_layers: int,
                    batch: int):
    """Whole TransformerEncoder (all layers) in one invocation.

    x_ref    : (T, E)      flattened (seq*batch, embed) tokens
    wqkv_ref : (L, E, 3E)  fused Q/K/V projection weights (x @ W convention)
    wo_ref   : (L, E, E)   attention output projection
    w1_ref   : (L, E, F), w2_ref: (L, F, E)  feed-forward weights
    bqkv_ref : (L, 1, 3E)  fused Q/K/V bias
    bf1_ref  : (L, 1, F)   first FFN bias
    vec_ref  : (L, 6, E)   packed biases + LayerNorm params (see _B* rows)
    """
    T, E = x_ref.shape
    dh = E // n_head
    scale = 1.0 / math.sqrt(dh)

    # Additive cross-batch mask built in-kernel: token t belongs to batch
    # t % B (s-major flatten of (S, B, E)); queries only attend within batch.
    rb = jax.lax.broadcasted_iota(jnp.int32, (T, T), 0) % batch
    cb = jax.lax.broadcasted_iota(jnp.int32, (T, T), 1) % batch
    mask = jnp.where(rb == cb, 0.0, NEG_INF).astype(jnp.float32)

    x = x_ref[...].astype(jnp.float32)                  # (T, E)

    for l in range(n_layers):                           # static unroll, weights in VMEM
        wqkv = wqkv_ref[l]                              # (E, 3E)
        wo = wo_ref[l]                                  # (E, E)
        w1 = w1_ref[l]                                  # (E, F)
        w2 = w2_ref[l]                                  # (F, E)
        bqkv = bqkv_ref[l]                              # (1, 3E)
        bf1 = bf1_ref[l]                                # (1, F)
        vec = vec_ref[l]                                # (6, E)
        bo, g1, be1 = vec[_BO:_BO + 1], vec[_G1:_G1 + 1], vec[_BE1:_BE1 + 1]
        bf2, g2, be2 = vec[_BF2:_BF2 + 1], vec[_G2:_G2 + 1], vec[_BE2:_BE2 + 1]

        # ---- multi-head self-attention (Q = K = V = x), fused QKV matmul ----
        qkv = jnp.dot(x, wqkv, preferred_element_type=jnp.float32) + bqkv

        head_outs = []
        for h in range(n_head):                         # short static head loop
            qh = qkv[:, h * dh:(h + 1) * dh]            # (T, Dh)
            kh = qkv[:, E + h * dh:E + (h + 1) * dh]
            vh = qkv[:, 2 * E + h * dh:2 * E + (h + 1) * dh]
            s = jnp.dot(qh, kh.T, preferred_element_type=jnp.float32) * scale + mask
            s = s - jnp.max(s, axis=-1, keepdims=True)  # stable softmax
            p = jnp.exp(s)
            p = p / jnp.sum(p, axis=-1, keepdims=True)
            head_outs.append(jnp.dot(p, vh, preferred_element_type=jnp.float32))
        attn = jnp.concatenate(head_outs, axis=-1)      # (T, E)
        attn = jnp.dot(attn, wo, preferred_element_type=jnp.float32) + bo

        # ---- residual + LayerNorm 1 (post-norm, biased variance) ----
        y = x + attn
        mu = jnp.mean(y, axis=-1, keepdims=True)
        var = jnp.mean((y - mu) ** 2, axis=-1, keepdims=True)
        y = (y - mu) * jax.lax.rsqrt(var + EPS) * g1 + be1

        # ---- feed-forward: Linear -> ReLU -> Linear ----
        h1 = jnp.dot(y, w1, preferred_element_type=jnp.float32) + bf1
        h1 = jnp.maximum(h1, 0.0)
        z = jnp.dot(h1, w2, preferred_element_type=jnp.float32) + bf2

        # ---- residual + LayerNorm 2 ----
        y2 = y + z
        mu2 = jnp.mean(y2, axis=-1, keepdims=True)
        var2 = jnp.mean((y2 - mu2) ** 2, axis=-1, keepdims=True)
        x = (y2 - mu2) * jax.lax.rsqrt(var2 + EPS) * g2 + be2

    o_ref[...] = x.astype(o_ref.dtype)


def transformer_encoder(src_sbe, params):
    """TransformerEncoder.forward (norm=None): one grid-less pallas_call."""
    S, B, E = src_sbe.shape
    L = params["w_qkv"].shape[0]
    T = S * B

    x = src_sbe.reshape(T, E)                           # free row-major reshape

    kernel = functools.partial(_encoder_kernel, n_head=N_HEAD, n_layers=L,
                               batch=B)
    vmem = lambda: pl.BlockSpec(memory_space=pltpu.MemorySpace.VMEM)
    out = pl.pallas_call(
        kernel,
        out_shape=jax.ShapeDtypeStruct((T, E), src_sbe.dtype),
        in_specs=[vmem() for _ in range(8)],            # whole arrays into VMEM
        out_specs=vmem(),
    )(x, params["w_qkv"], params["w_o"], params["w1"], params["w2"],
      params["b_qkv"], params["bf1"], params["vec"])
    return out.reshape(S, B, E)                         # back to (seq, batch, embed)


def init_stacked_params(key, n_layers, E, F):
    """Per-layer weights stacked on a leading layer axis (x @ W convention,
    W shaped (in, out); transpose when importing PyTorch (out, in) weights)."""
    sE = 1.0 / math.sqrt(E)
    sF = 1.0 / math.sqrt(F)
    wqkvs, wos, w1s, w2s, bqkvs, bf1s, vecs = [], [], [], [], [], [], []
    for k in jax.random.split(key, n_layers):
        ks = jax.random.split(k, 4)
        wqkvs.append(jax.random.uniform(ks[0], (E, 3 * E), jnp.float32, -sE, sE))
        wos.append(jax.random.uniform(ks[1], (E, E), jnp.float32, -sE, sE))
        w1s.append(jax.random.uniform(ks[2], (E, F), jnp.float32, -sE, sE))
        w2s.append(jax.random.uniform(ks[3], (F, E), jnp.float32, -sF, sF))
        bqkvs.append(jnp.zeros((1, 3 * E), jnp.float32))
        bf1s.append(jnp.zeros((1, F), jnp.float32))
        zeros_e = jnp.zeros((E,), jnp.float32)
        ones_e = jnp.ones((E,), jnp.float32)
        vecs.append(jnp.stack([zeros_e, ones_e, zeros_e,     # bo g1 be1
                               zeros_e, ones_e, zeros_e]))   # bf2 g2 be2
    return {
        "w_qkv": jnp.stack(wqkvs),   # (L, E, 3E)
        "w_o": jnp.stack(wos),       # (L, E, E)
        "w1": jnp.stack(w1s),        # (L, E, F)
        "w2": jnp.stack(w2s),        # (L, F, E)
        "b_qkv": jnp.stack(bqkvs),   # (L, 1, 3E)
        "bf1": jnp.stack(bf1s),      # (L, 1, F)
        "vec": jnp.stack(vecs),      # (L, 6, E)
    }


def _encoder_reference(src_sbe, params, n_head):
    """Pure-JAX reference mirroring the kernel math (for correctness check)."""
    S, B, E = src_sbe.shape
    T = S * B
    L = params["w_qkv"].shape[0]
    dh = E // n_head
    hp = jax.lax.Precision.HIGHEST
    x = src_sbe.reshape(T, E).astype(jnp.float32)
    bid = jnp.arange(T, dtype=jnp.int32) % B
    mask = jnp.where(bid[:, None] == bid[None, :], 0.0, NEG_INF).astype(jnp.float32)
    for l in range(L):
        vec = params["vec"][l]
        bo, g1, be1 = vec[_BO:_BO + 1], vec[_G1:_G1 + 1], vec[_BE1:_BE1 + 1]
        bf2, g2, be2 = vec[_BF2:_BF2 + 1], vec[_G2:_G2 + 1], vec[_BE2:_BE2 + 1]
        qkv = jnp.dot(x, params["w_qkv"][l], precision=hp) + params["b_qkv"][l]
        outs = []
        for h in range(n_head):
            qh = qkv[:, h * dh:(h + 1) * dh]
            kh = qkv[:, E + h * dh:E + (h + 1) * dh]
            vh = qkv[:, 2 * E + h * dh:2 * E + (h + 1) * dh]
            s = jnp.dot(qh, kh.T, precision=hp) / math.sqrt(dh) + mask
            s = s - jnp.max(s, axis=-1, keepdims=True)
            p = jnp.exp(s)
            p = p / jnp.sum(p, axis=-1, keepdims=True)
            outs.append(jnp.dot(p, vh, precision=hp))
        attn = jnp.dot(jnp.concatenate(outs, -1), params["w_o"][l], precision=hp) + bo
        y = x + attn
        mu = jnp.mean(y, -1, keepdims=True)
        var = jnp.mean((y - mu) ** 2, -1, keepdims=True)
        y = (y - mu) * jax.lax.rsqrt(var + EPS) * g1 + be1
        h1 = jnp.maximum(jnp.dot(y, params["w1"][l], precision=hp) + params["bf1"][l], 0.0)
        z = jnp.dot(h1, params["w2"][l], precision=hp) + bf2
        y2 = y + z
        mu2 = jnp.mean(y2, -1, keepdims=True)
        var2 = jnp.mean((y2 - mu2) ** 2, -1, keepdims=True)
        x = (y2 - mu2) * jax.lax.rsqrt(var2 + EPS) * g2 + be2
    return x.reshape(S, B, E)


if __name__ == "__main__":
    root = jax.random.PRNGKey(0)
    k_x, k_p = jax.random.split(root)

    # src in PyTorch (seq, batch, embed) layout
    src = jax.random.normal(k_x, (SEQ, BATCH, D_MODEL), jnp.float32)
    params = init_stacked_params(k_p, N_LAYERS, D_MODEL, D_FF)

    out = transformer_encoder(src, params)
    out = jax.block_until_ready(out)

    assert out.shape == (SEQ, BATCH, D_MODEL), out.shape
    assert bool(jnp.all(jnp.isfinite(out)))
    ref = _encoder_reference(src, params, N_HEAD)
    assert bool(jnp.allclose(out, ref, atol=2e-2, rtol=2e-2)), \
        float(jnp.max(jnp.abs(out - ref)))
    print("KERNEL_OK")
</pallas_src>

<mosaic_0001>
module attributes {stable_mosaic.version = 11 : i64} {
  func.func @_encoder_kernel(%arg0: memref<16x32xf32, #tpu.memory_space<vmem>>, %arg1: memref<2x32x96xf32, #tpu.memory_space<vmem>>, %arg2: memref<2x32x32xf32, #tpu.memory_space<vmem>>, %arg3: memref<2x32x64xf32, #tpu.memory_space<vmem>>, %arg4: memref<2x64x32xf32, #tpu.memory_space<vmem>>, %arg5: memref<2x1x96xf32, #tpu.memory_space<vmem>>, %arg6: memref<2x1x64xf32, #tpu.memory_space<vmem>>, %arg7: memref<2x6x32xf32, #tpu.memory_space<vmem>>, %arg8: memref<16x32xf32, #tpu.memory_space<vmem>>) attributes {dimension_semantics = [], scalar_prefetch = 0 : i64, scratch_operands = 0 : i64, tpu.core_type = #tpu.core_type<tc>} {
    %0 = tpu.iota {dimensions = array<i32: 0>} : vector<16x16xi32>
    %c2_i32 = arith.constant 2 : i32
    %c0_i32 = arith.constant 0 : i32
    %1 = arith.cmpi eq, %c2_i32, %c0_i32 : i32
    %c1_i32 = arith.constant 1 : i32
    %2 = arith.select %1, %c1_i32, %c2_i32 : i32
    %3 = vector.broadcast %2 : i32 to vector<16x16xi32>
    %4 = arith.remsi %0, %3 : vector<16x16xi32>
    %c0_i32_0 = arith.constant 0 : i32
    %5 = vector.broadcast %c0_i32_0 : i32 to vector<16x16xi32>
    %6 = arith.cmpi ne, %4, %5 : vector<16x16xi32>
    %c0_i32_1 = arith.constant 0 : i32
    %7 = vector.broadcast %c0_i32_1 : i32 to vector<16x16xi32>
    %8 = arith.cmpi slt, %4, %7 : vector<16x16xi32>
    %c0_i32_2 = arith.constant 0 : i32
    %9 = arith.cmpi slt, %2, %c0_i32_2 : i32
    %10 = vector.broadcast %9 : i1 to vector<16x16xi1>
    %11 = vector.broadcast %10 : vector<16x16xi1> to vector<16x16xi1>
    %12 = arith.xori %8, %11 : vector<16x16xi1>
    %13 = arith.andi %12, %6 : vector<16x16xi1>
    %14 = vector.broadcast %2 : i32 to vector<16x16xi32>
    %15 = arith.addi %4, %14 : vector<16x16xi32>
    %16 = arith.select %13, %15, %4 : vector<16x16xi1>, vector<16x16xi32>
    %17 = tpu.iota {dimensions = array<i32: 1>} : vector<16x16xi32>
    %c2_i32_3 = arith.constant 2 : i32
    %c0_i32_4 = arith.constant 0 : i32
    %18 = arith.cmpi eq, %c2_i32_3, %c0_i32_4 : i32
    %c1_i32_5 = arith.constant 1 : i32
    %19 = arith.select %18, %c1_i32_5, %c2_i32_3 : i32
    %20 = vector.broadcast %19 : i32 to vector<16x16xi32>
    %21 = arith.remsi %17, %20 : vector<16x16xi32>
    %c0_i32_6 = arith.constant 0 : i32
    %22 = vector.broadcast %c0_i32_6 : i32 to vector<16x16xi32>
    %23 = arith.cmpi ne, %21, %22 : vector<16x16xi32>
    %c0_i32_7 = arith.constant 0 : i32
    %24 = vector.broadcast %c0_i32_7 : i32 to vector<16x16xi32>
    %25 = arith.cmpi slt, %21, %24 : vector<16x16xi32>
    %c0_i32_8 = arith.constant 0 : i32
    %26 = arith.cmpi slt, %19, %c0_i32_8 : i32
    %27 = vector.broadcast %26 : i1 to vector<16x16xi1>
    %28 = vector.broadcast %27 : vector<16x16xi1> to vector<16x16xi1>
    %29 = arith.xori %25, %28 : vector<16x16xi1>
    %30 = arith.andi %29, %23 : vector<16x16xi1>
    %31 = vector.broadcast %19 : i32 to vector<16x16xi32>
    %32 = arith.addi %21, %31 : vector<16x16xi32>
    %33 = arith.select %30, %32, %21 : vector<16x16xi1>, vector<16x16xi32>
    %34 = arith.cmpi eq, %16, %33 : vector<16x16xi32>
    %cst = arith.constant 0.000000e+00 : f32
    %cst_9 = arith.constant -1.000000e+30 : f32
    %35 = vector.broadcast %cst : f32 to vector<16x16xf32>
    %36 = vector.broadcast %cst_9 : f32 to vector<16x16xf32>
    %37 = arith.select %34, %35, %36 : vector<16x16xi1>, vector<16x16xf32>
    %c0 = arith.constant 0 : index
    %c0_10 = arith.constant 0 : index
    %38 = vector.load %arg0[%c0, %c0_10] : memref<16x32xf32, #tpu.memory_space<vmem>>, vector<16x32xf32>
    %c0_11 = arith.constant 0 : index
    %c0_12 = arith.constant 0 : index
    %c0_13 = arith.constant 0 : index
    %39 = vector.load %arg1[%c0_11, %c0_12, %c0_13] : memref<2x32x96xf32, #tpu.memory_space<vmem>>, vector<1x32x96xf32>
    %40 = vector.shape_cast %39 : vector<1x32x96xf32> to vector<32x96xf32>
    %c0_14 = arith.constant 0 : index
    %c0_15 = arith.constant 0 : index
    %c0_16 = arith.constant 0 : index
    %41 = vector.load %arg2[%c0_14, %c0_15, %c0_16] : memref<2x32x32xf32, #tpu.memory_space<vmem>>, vector<1x32x32xf32>
    %42 = vector.shape_cast %41 : vector<1x32x32xf32> to vector<32x32xf32>
    %c0_17 = arith.constant 0 : index
    %c0_18 = arith.constant 0 : index
    %c0_19 = arith.constant 0 : index
    %43 = vector.load %arg3[%c0_17, %c0_18, %c0_19] : memref<2x32x64xf32, #tpu.memory_space<vmem>>, vector<1x32x64xf32>
    %44 = vector.shape_cast %43 : vector<1x32x64xf32> to vector<32x64xf32>
    %c0_20 = arith.constant 0 : index
    %c0_21 = arith.constant 0 : index
    %c0_22 = arith.constant 0 : index
    %45 = vector.load %arg4[%c0_20, %c0_21, %c0_22] : memref<2x64x32xf32, #tpu.memory_space<vmem>>, vector<1x64x32xf32>
    %46 = vector.shape_cast %45 : vector<1x64x32xf32> to vector<64x32xf32>
    %c0_23 = arith.constant 0 : index
    %c0_24 = arith.constant 0 : index
    %c0_25 = arith.constant 0 : index
    %47 = vector.load %arg5[%c0_23, %c0_24, %c0_25] : memref<2x1x96xf32, #tpu.memory_space<vmem>>, vector<1x1x96xf32>
    %48 = vector.shape_cast %47 : vector<1x1x96xf32> to vector<1x96xf32>
    %c0_26 = arith.constant 0 : index
    %c0_27 = arith.constant 0 : index
    %c0_28 = arith.constant 0 : index
    %49 = vector.load %arg6[%c0_26, %c0_27, %c0_28] : memref<2x1x64xf32, #tpu.memory_space<vmem>>, vector<1x1x64xf32>
    %50 = vector.shape_cast %49 : vector<1x1x64xf32> to vector<1x64xf32>
    %c0_29 = arith.constant 0 : index
    %c0_30 = arith.constant 0 : index
    %c0_31 = arith.constant 0 : index
    %51 = vector.load %arg7[%c0_29, %c0_30, %c0_31] : memref<2x6x32xf32, #tpu.memory_space<vmem>>, vector<1x6x32xf32>
    %52 = vector.shape_cast %51 : vector<1x6x32xf32> to vector<6x32xf32>
    %53 = vector.extract_strided_slice %52 {offsets = [0, 0], sizes = [1, 32], strides = [1, 1]} : vector<6x32xf32> to vector<1x32xf32>
    %54 = vector.extract_strided_slice %52 {offsets = [1, 0], sizes = [1, 32], strides = [1, 1]} : vector<6x32xf32> to vector<1x32xf32>
    %55 = vector.extract_strided_slice %52 {offsets = [2, 0], sizes = [1, 32], strides = [1, 1]} : vector<6x32xf32> to vector<1x32xf32>
    %56 = vector.extract_strided_slice %52 {offsets = [3, 0], sizes = [1, 32], strides = [1, 1]} : vector<6x32xf32> to vector<1x32xf32>
    %57 = vector.extract_strided_slice %52 {offsets = [4, 0], sizes = [1, 32], strides = [1, 1]} : vector<6x32xf32> to vector<1x32xf32>
    %58 = vector.extract_strided_slice %52 {offsets = [5, 0], sizes = [1, 32], strides = [1, 1]} : vector<6x32xf32> to vector<1x32xf32>
    %cst_32 = arith.constant dense<0.000000e+00> : vector<16x96xf32>
    %59 = tpu.matmul %38, %40, %cst_32 {dimension_numbers = #tpu.dot_dimension_numbers<[1], [0], [0], [1], [0, 0, 1, 1], [], []>} : vector<16x32xf32>, vector<32x96xf32>, vector<16x96xf32> -> vector<16x96xf32>
    %60 = vector.broadcast %48 : vector<1x96xf32> to vector<16x96xf32>
    %61 = arith.addf %59, %60 : vector<16x96xf32>
    %62 = vector.extract_strided_slice %61 {offsets = [0, 0], sizes = [16, 8], strides = [1, 1]} : vector<16x96xf32> to vector<16x8xf32>
    %63 = vector.extract_strided_slice %61 {offsets = [0, 32], sizes = [16, 8], strides = [1, 1]} : vector<16x96xf32> to vector<16x8xf32>
    %64 = vector.extract_strided_slice %61 {offsets = [0, 64], sizes = [16, 8], strides = [1, 1]} : vector<16x96xf32> to vector<16x8xf32>
    %65 = tpu.transpose %63, [1, 0] : vector<16x8xf32> -> vector<8x16xf32>
    %cst_33 = arith.constant dense<0.000000e+00> : vector<16x16xf32>
    %66 = tpu.matmul %62, %65, %cst_33 {dimension_numbers = #tpu.dot_dimension_numbers<[1], [0], [0], [1], [0, 0, 1, 1], [], []>} : vector<16x8xf32>, vector<8x16xf32>, vector<16x16xf32> -> vector<16x16xf32>
    %cst_34 = arith.constant 0.353553385 : f32
    %67 = vector.broadcast %cst_34 : f32 to vector<16x16xf32>
    %68 = arith.mulf %66, %67 : vector<16x16xf32>
    %69 = arith.addf %68, %37 : vector<16x16xf32>
    %cst_35 = arith.constant dense<0xFF800000> : vector<16xf32>
    %70 = vector.multi_reduction <maximumf>, %69, %cst_35 [1] : vector<16x16xf32> to vector<16xf32>
    %71 = vector.shape_cast %70 : vector<16xf32> to vector<16x1xf32>
    %72 = vector.broadcast %71 : vector<16x1xf32> to vector<16x16xf32>
    %73 = arith.subf %69, %72 : vector<16x16xf32>
    %74 = math.exp %73 : vector<16x16xf32>
    %cst_36 = arith.constant dense<0.000000e+00> : vector<16xf32>
    %75 = vector.multi_reduction <add>, %74, %cst_36 [1] : vector<16x16xf32> to vector<16xf32>
    %76 = vector.shape_cast %75 : vector<16xf32> to vector<16x1xf32>
    %77 = vector.broadcast %76 : vector<16x1xf32> to vector<16x16xf32>
    %78 = arith.divf %74, %77 : vector<16x16xf32>
    %cst_37 = arith.constant dense<0.000000e+00> : vector<16x8xf32>
    %79 = tpu.matmul %78, %64, %cst_37 {dimension_numbers = #tpu.dot_dimension_numbers<[1], [0], [0], [1], [0, 0, 1, 1], [], []>} : vector<16x16xf32>, vector<16x8xf32>, vector<16x8xf32> -> vector<16x8xf32>
    %80 = vector.extract_strided_slice %61 {offsets = [0, 8], sizes = [16, 8], strides = [1, 1]} : vector<16x96xf32> to vector<16x8xf32>
    %81 = vector.extract_strided_slice %61 {offsets = [0, 40], sizes = [16, 8], strides = [1, 1]} : vector<16x96xf32> to vector<16x8xf32>
    %82 = vector.extract_strided_slice %61 {offsets = [0, 72], sizes = [16, 8], strides = [1, 1]} : vector<16x96xf32> to vector<16x8xf32>
    %83 = tpu.transpose %81, [1, 0] : vector<16x8xf32> -> vector<8x16xf32>
    %cst_38 = arith.constant dense<0.000000e+00> : vector<16x16xf32>
    %84 = tpu.matmul %80, %83, %cst_38 {dimension_numbers = #tpu.dot_dimension_numbers<[1], [0], [0], [1], [0, 0, 1, 1], [], []>} : vector<16x8xf32>, vector<8x16xf32>, vector<16x16xf32> -> vector<16x16xf32>
    %cst_39 = arith.constant 0.353553385 : f32
    %85 = vector.broadcast %cst_39 : f32 to vector<16x16xf32>
    %86 = arith.mulf %84, %85 : vector<16x16xf32>
    %87 = arith.addf %86, %37 : vector<16x16xf32>
    %cst_40 = arith.constant dense<0xFF800000> : vector<16xf32>
    %88 = vector.multi_reduction <maximumf>, %87, %cst_40 [1] : vector<16x16xf32> to vector<16xf32>
    %89 = vector.shape_cast %88 : vector<16xf32> to vector<16x1xf32>
    %90 = vector.broadcast %89 : vector<16x1xf32> to vector<16x16xf32>
    %91 = arith.subf %87, %90 : vector<16x16xf32>
    %92 = math.exp %91 : vector<16x16xf32>
    %cst_41 = arith.constant dense<0.000000e+00> : vector<16xf32>
    %93 = vector.multi_reduction <add>, %92, %cst_41 [1] : vector<16x16xf32> to vector<16xf32>
    %94 = vector.shape_cast %93 : vector<16xf32> to vector<16x1xf32>
    %95 = vector.broadcast %94 : vector<16x1xf32> to vector<16x16xf32>
    %96 = arith.divf %92, %95 : vector<16x16xf32>
    %cst_42 = arith.constant dense<0.000000e+00> : vector<16x8xf32>
    %97 = tpu.matmul %96, %82, %cst_42 {dimension_numbers = #tpu.dot_dimension_numbers<[1], [0], [0], [1], [0, 0, 1, 1], [], []>} : vector<16x16xf32>, vector<16x8xf32>, vector<16x8xf32> -> vector<16x8xf32>
    %98 = vector.extract_strided_slice %61 {offsets = [0, 16], sizes = [16, 8], strides = [1, 1]} : vector<16x96xf32> to vector<16x8xf32>
    %99 = vector.extract_strided_slice %61 {offsets = [0, 48], sizes = [16, 8], strides = [1, 1]} : vector<16x96xf32> to vector<16x8xf32>
    %100 = vector.extract_strided_slice %61 {offsets = [0, 80], sizes = [16, 8], strides = [1, 1]} : vector<16x96xf32> to vector<16x8xf32>
    %101 = tpu.transpose %99, [1, 0] : vector<16x8xf32> -> vector<8x16xf32>
    %cst_43 = arith.constant dense<0.000000e+00> : vector<16x16xf32>
    %102 = tpu.matmul %98, %101, %cst_43 {dimension_numbers = #tpu.dot_dimension_numbers<[1], [0], [0], [1], [0, 0, 1, 1], [], []>} : vector<16x8xf32>, vector<8x16xf32>, vector<16x16xf32> -> vector<16x16xf32>
    %cst_44 = arith.constant 0.353553385 : f32
    %103 = vector.broadcast %cst_44 : f32 to vector<16x16xf32>
    %104 = arith.mulf %102, %103 : vector<16x16xf32>
    %105 = arith.addf %104, %37 : vector<16x16xf32>
    %cst_45 = arith.constant dense<0xFF800000> : vector<16xf32>
    %106 = vector.multi_reduction <maximumf>, %105, %cst_45 [1] : vector<16x16xf32> to vector<16xf32>
    %107 = vector.shape_cast %106 : vector<16xf32> to vector<16x1xf32>
    %108 = vector.broadcast %107 : vector<16x1xf32> to vector<16x16xf32>
    %109 = arith.subf %105, %108 : vector<16x16xf32>
    %110 = math.exp %109 : vector<16x16xf32>
    %cst_46 = arith.constant dense<0.000000e+00> : vector<16xf32>
    %111 = vector.multi_reduction <add>, %110, %cst_46 [1] : vector<16x16xf32> to vector<16xf32>
    %112 = vector.shape_cast %111 : vector<16xf32> to vector<16x1xf32>
    %113 = vector.broadcast %112 : vector<16x1xf32> to vector<16x16xf32>
    %114 = arith.divf %110, %113 : vector<16x16xf32>
    %cst_47 = arith.constant dense<0.000000e+00> : vector<16x8xf32>
    %115 = tpu.matmul %114, %100, %cst_47 {dimension_numbers = #tpu.dot_dimension_numbers<[1], [0], [0], [1], [0, 0, 1, 1], [], []>} : vector<16x16xf32>, vector<16x8xf32>, vector<16x8xf32> -> vector<16x8xf32>
    %116 = vector.extract_strided_slice %61 {offsets = [0, 24], sizes = [16, 8], strides = [1, 1]} : vector<16x96xf32> to vector<16x8xf32>
    %117 = vector.extract_strided_slice %61 {offsets = [0, 56], sizes = [16, 8], strides = [1, 1]} : vector<16x96xf32> to vector<16x8xf32>
    %118 = vector.extract_strided_slice %61 {offsets = [0, 88], sizes = [16, 8], strides = [1, 1]} : vector<16x96xf32> to vector<16x8xf32>
    %119 = tpu.transpose %117, [1, 0] : vector<16x8xf32> -> vector<8x16xf32>
    %cst_48 = arith.constant dense<0.000000e+00> : vector<16x16xf32>
    %120 = tpu.matmul %116, %119, %cst_48 {dimension_numbers = #tpu.dot_dimension_numbers<[1], [0], [0], [1], [0, 0, 1, 1], [], []>} : vector<16x8xf32>, vector<8x16xf32>, vector<16x16xf32> -> vector<16x16xf32>
    %cst_49 = arith.constant 0.353553385 : f32
    %121 = vector.broadcast %cst_49 : f32 to vector<16x16xf32>
    %122 = arith.mulf %120, %121 : vector<16x16xf32>
    %123 = arith.addf %122, %37 : vector<16x16xf32>
    %cst_50 = arith.constant dense<0xFF800000> : vector<16xf32>
    %124 = vector.multi_reduction <maximumf>, %123, %cst_50 [1] : vector<16x16xf32> to vector<16xf32>
    %125 = vector.shape_cast %124 : vector<16xf32> to vector<16x1xf32>
    %126 = vector.broadcast %125 : vector<16x1xf32> to vector<16x16xf32>
    %127 = arith.subf %123, %126 : vector<16x16xf32>
    %128 = math.exp %127 : vector<16x16xf32>
    %cst_51 = arith.constant dense<0.000000e+00> : vector<16xf32>
    %129 = vector.multi_reduction <add>, %128, %cst_51 [1] : vector<16x16xf32> to vector<16xf32>
    %130 = vector.shape_cast %129 : vector<16xf32> to vector<16x1xf32>
    %131 = vector.broadcast %130 : vector<16x1xf32> to vector<16x16xf32>
    %132 = arith.divf %128, %131 : vector<16x16xf32>
    %cst_52 = arith.constant dense<0.000000e+00> : vector<16x8xf32>
    %133 = tpu.matmul %132, %118, %cst_52 {dimension_numbers = #tpu.dot_dimension_numbers<[1], [0], [0], [1], [0, 0, 1, 1], [], []>} : vector<16x16xf32>, vector<16x8xf32>, vector<16x8xf32> -> vector<16x8xf32>
    %134 = tpu.concatenate %79, %97, %115, %133 in 1 : vector<16x8xf32>, vector<16x8xf32>, vector<16x8xf32>, vector<16x8xf32> -> vector<16x32xf32>
    %cst_53 = arith.constant dense<0.000000e+00> : vector<16x32xf32>
    %135 = tpu.matmul %134, %42, %cst_53 {dimension_numbers = #tpu.dot_dimension_numbers<[1], [0], [0], [1], [0, 0, 1, 1], [], []>} : vector<16x32xf32>, vector<32x32xf32>, vector<16x32xf32> -> vector<16x32xf32>
    %136 = vector.broadcast %53 : vector<1x32xf32> to vector<16x32xf32>
    %137 = arith.addf %135, %136 : vector<16x32xf32>
    %138 = arith.addf %38, %137 : vector<16x32xf32>
    %cst_54 = arith.constant dense<0.000000e+00> : vector<16xf32>
    %139 = vector.multi_reduction <add>, %138, %cst_54 [1] : vector<16x32xf32> to vector<16xf32>
    %140 = vector.shape_cast %139 : vector<16xf32> to vector<16x1xf32>
    %cst_55 = arith.constant 3.200000e+01 : f32
    %141 = vector.broadcast %cst_55 : f32 to vector<16x1xf32>
    %142 = arith.divf %140, %141 : vector<16x1xf32>
    %143 = vector.broadcast %142 : vector<16x1xf32> to vector<16x32xf32>
    %144 = arith.subf %138, %143 : vector<16x32xf32>
    %145 = arith.mulf %144, %144 : vector<16x32xf32>
    %cst_56 = arith.constant dense<0.000000e+00> : vector<16xf32>
    %146 = vector.multi_reduction <add>, %145, %cst_56 [1] : vector<16x32xf32> to vector<16xf32>
    %147 = vector.shape_cast %146 : vector<16xf32> to vector<16x1xf32>
    %cst_57 = arith.constant 3.200000e+01 : f32
    %148 = vector.broadcast %cst_57 : f32 to vector<16x1xf32>
    %149 = arith.divf %147, %148 : vector<16x1xf32>
    %150 = vector.broadcast %142 : vector<16x1xf32> to vector<16x32xf32>
    %151 = arith.subf %138, %150 : vector<16x32xf32>
    %cst_58 = arith.constant 9.99999974E-6 : f32
    %152 = vector.broadcast %cst_58 : f32 to vector<16x1xf32>
    %153 = arith.addf %149, %152 : vector<16x1xf32>
    %154 = math.rsqrt %153 : vector<16x1xf32>
    %155 = vector.broadcast %154 : vector<16x1xf32> to vector<16x32xf32>
    %156 = arith.mulf %151, %155 : vector<16x32xf32>
    %157 = vector.broadcast %54 : vector<1x32xf32> to vector<16x32xf32>
    %158 = arith.mulf %156, %157 : vector<16x32xf32>
    %159 = vector.broadcast %55 : vector<1x32xf32> to vector<16x32xf32>
    %160 = arith.addf %158, %159 : vector<16x32xf32>
    %cst_59 = arith.constant dense<0.000000e+00> : vector<16x64xf32>
    %161 = tpu.matmul %160, %44, %cst_59 {dimension_numbers = #tpu.dot_dimension_numbers<[1], [0], [0], [1], [0, 0, 1, 1], [], []>} : vector<16x32xf32>, vector<32x64xf32>, vector<16x64xf32> -> vector<16x64xf32>
    %162 = vector.broadcast %50 : vector<1x64xf32> to vector<16x64xf32>
    %163 = arith.addf %161, %162 : vector<16x64xf32>
    %cst_60 = arith.constant 0.000000e+00 : f32
    %164 = vector.broadcast %cst_60 : f32 to vector<16x64xf32>
    %165 = arith.maximumf %163, %164 : vector<16x64xf32>
    %cst_61 = arith.constant dense<0.000000e+00> : vector<16x32xf32>
    %166 = tpu.matmul %165, %46, %cst_61 {dimension_numbers = #tpu.dot_dimension_numbers<[1], [0], [0], [1], [0, 0, 1, 1], [], []>} : vector<16x64xf32>, vector<64x32xf32>, vector<16x32xf32> -> vector<16x32xf32>
    %167 = vector.broadcast %56 : vector<1x32xf32> to vector<16x32xf32>
    %168 = arith.addf %166, %167 : vector<16x32xf32>
    %169 = arith.addf %160, %168 : vector<16x32xf32>
    %cst_62 = arith.constant dense<0.000000e+00> : vector<16xf32>
    %170 = vector.multi_reduction <add>, %169, %cst_62 [1] : vector<16x32xf32> to vector<16xf32>
    %171 = vector.shape_cast %170 : vector<16xf32> to vector<16x1xf32>
    %cst_63 = arith.constant 3.200000e+01 : f32
    %172 = vector.broadcast %cst_63 : f32 to vector<16x1xf32>
    %173 = arith.divf %171, %172 : vector<16x1xf32>
    %174 = vector.broadcast %173 : vector<16x1xf32> to vector<16x32xf32>
    %175 = arith.subf %169, %174 : vector<16x32xf32>
    %176 = arith.mulf %175, %175 : vector<16x32xf32>
    %cst_64 = arith.constant dense<0.000000e+00> : vector<16xf32>
    %177 = vector.multi_reduction <add>, %176, %cst_64 [1] : vector<16x32xf32> to vector<16xf32>
    %178 = vector.shape_cast %177 : vector<16xf32> to vector<16x1xf32>
    %cst_65 = arith.constant 3.200000e+01 : f32
    %179 = vector.broadcast %cst_65 : f32 to vector<16x1xf32>
    %180 = arith.divf %178, %179 : vector<16x1xf32>
    %181 = vector.broadcast %173 : vector<16x1xf32> to vector<16x32xf32>
    %182 = arith.subf %169, %181 : vector<16x32xf32>
    %cst_66 = arith.constant 9.99999974E-6 : f32
    %183 = vector.broadcast %cst_66 : f32 to vector<16x1xf32>
    %184 = arith.addf %180, %183 : vector<16x1xf32>
    %185 = math.rsqrt %184 : vector<16x1xf32>
    %186 = vector.broadcast %185 : vector<16x1xf32> to vector<16x32xf32>
    %187 = arith.mulf %182, %186 : vector<16x32xf32>
    %188 = vector.broadcast %57 : vector<1x32xf32> to vector<16x32xf32>
    %189 = arith.mulf %187, %188 : vector<16x32xf32>
    %190 = vector.broadcast %58 : vector<1x32xf32> to vector<16x32xf32>
    %191 = arith.addf %189, %190 : vector<16x32xf32>
    %c1 = arith.constant 1 : index
    %c0_67 = arith.constant 0 : index
    %c0_68 = arith.constant 0 : index
    %192 = vector.load %arg1[%c1, %c0_67, %c0_68] : memref<2x32x96xf32, #tpu.memory_space<vmem>>, vector<1x32x96xf32>
    %193 = vector.shape_cast %192 : vector<1x32x96xf32> to vector<32x96xf32>
    %c1_69 = arith.constant 1 : index
    %c0_70 = arith.constant 0 : index
    %c0_71 = arith.constant 0 : index
    %194 = vector.load %arg2[%c1_69, %c0_70, %c0_71] : memref<2x32x32xf32, #tpu.memory_space<vmem>>, vector<1x32x32xf32>
    %195 = vector.shape_cast %194 : vector<1x32x32xf32> to vector<32x32xf32>
    %c1_72 = arith.constant 1 : index
    %c0_73 = arith.constant 0 : index
    %c0_74 = arith.constant 0 : index
    %196 = vector.load %arg3[%c1_72, %c0_73, %c0_74] : memref<2x32x64xf32, #tpu.memory_space<vmem>>, vector<1x32x64xf32>
    %197 = vector.shape_cast %196 : vector<1x32x64xf32> to vector<32x64xf32>
    %c1_75 = arith.constant 1 : index
    %c0_76 = arith.constant 0 : index
    %c0_77 = arith.constant 0 : index
    %198 = vector.load %arg4[%c1_75, %c0_76, %c0_77] : memref<2x64x32xf32, #tpu.memory_space<vmem>>, vector<1x64x32xf32>
    %199 = vector.shape_cast %198 : vector<1x64x32xf32> to vector<64x32xf32>
    %c1_78 = arith.constant 1 : index
    %c0_79 = arith.constant 0 : index
    %c0_80 = arith.constant 0 : index
    %200 = vector.load %arg5[%c1_78, %c0_79, %c0_80] : memref<2x1x96xf32, #tpu.memory_space<vmem>>, vector<1x1x96xf32>
    %201 = vector.shape_cast %200 : vector<1x1x96xf32> to vector<1x96xf32>
    %c1_81 = arith.constant 1 : index
    %c0_82 = arith.constant 0 : index
    %c0_83 = arith.constant 0 : index
    %202 = vector.load %arg6[%c1_81, %c0_82, %c0_83] : memref<2x1x64xf32, #tpu.memory_space<vmem>>, vector<1x1x64xf32>
    %203 = vector.shape_cast %202 : vector<1x1x64xf32> to vector<1x64xf32>
    %c1_84 = arith.constant 1 : index
    %c0_85 = arith.constant 0 : index
    %c0_86 = arith.constant 0 : index
    %204 = vector.load %arg7[%c1_84, %c0_85, %c0_86] : memref<2x6x32xf32, #tpu.memory_space<vmem>>, vector<1x6x32xf32>
    %205 = vector.shape_cast %204 : vector<1x6x32xf32> to vector<6x32xf32>
    %206 = vector.extract_strided_slice %205 {offsets = [0, 0], sizes = [1, 32], strides = [1, 1]} : vector<6x32xf32> to vector<1x32xf32>
    %207 = vector.extract_strided_slice %205 {offsets = [1, 0], sizes = [1, 32], strides = [1, 1]} : vector<6x32xf32> to vector<1x32xf32>
    %208 = vector.extract_strided_slice %205 {offsets = [2, 0], sizes = [1, 32], strides = [1, 1]} : vector<6x32xf32> to vector<1x32xf32>
    %209 = vector.extract_strided_slice %205 {offsets = [3, 0], sizes = [1, 32], strides = [1, 1]} : vector<6x32xf32> to vector<1x32xf32>
    %210 = vector.extract_strided_slice %205 {offsets = [4, 0], sizes = [1, 32], strides = [1, 1]} : vector<6x32xf32> to vector<1x32xf32>
    %211 = vector.extract_strided_slice %205 {offsets = [5, 0], sizes = [1, 32], strides = [1, 1]} : vector<6x32xf32> to vector<1x32xf32>
    %cst_87 = arith.constant dense<0.000000e+00> : vector<16x96xf32>
    %212 = tpu.matmul %191, %193, %cst_87 {dimension_numbers = #tpu.dot_dimension_numbers<[1], [0], [0], [1], [0, 0, 1, 1], [], []>} : vector<16x32xf32>, vector<32x96xf32>, vector<16x96xf32> -> vector<16x96xf32>
    %213 = vector.broadcast %201 : vector<1x96xf32> to vector<16x96xf32>
    %214 = arith.addf %212, %213 : vector<16x96xf32>
    %215 = vector.extract_strided_slice %214 {offsets = [0, 0], sizes = [16, 8], strides = [1, 1]} : vector<16x96xf32> to vector<16x8xf32>
    %216 = vector.extract_strided_slice %214 {offsets = [0, 32], sizes = [16, 8], strides = [1, 1]} : vector<16x96xf32> to vector<16x8xf32>
    %217 = vector.extract_strided_slice %214 {offsets = [0, 64], sizes = [16, 8], strides = [1, 1]} : vector<16x96xf32> to vector<16x8xf32>
    %218 = tpu.transpose %216, [1, 0] : vector<16x8xf32> -> vector<8x16xf32>
    %cst_88 = arith.constant dense<0.000000e+00> : vector<16x16xf32>
    %219 = tpu.matmul %215, %218, %cst_88 {dimension_numbers = #tpu.dot_dimension_numbers<[1], [0], [0], [1], [0, 0, 1, 1], [], []>} : vector<16x8xf32>, vector<8x16xf32>, vector<16x16xf32> -> vector<16x16xf32>
    %cst_89 = arith.constant 0.353553385 : f32
    %220 = vector.broadcast %cst_89 : f32 to vector<16x16xf32>
    %221 = arith.mulf %219, %220 : vector<16x16xf32>
    %222 = arith.addf %221, %37 : vector<16x16xf32>
    %cst_90 = arith.constant dense<0xFF800000> : vector<16xf32>
    %223 = vector.multi_reduction <maximumf>, %222, %cst_90 [1] : vector<16x16xf32> to vector<16xf32>
    %224 = vector.shape_cast %223 : vector<16xf32> to vector<16x1xf32>
    %225 = vector.broadcast %224 : vector<16x1xf32> to vector<16x16xf32>
    %226 = arith.subf %222, %225 : vector<16x16xf32>
    %227 = math.exp %226 : vector<16x16xf32>
    %cst_91 = arith.constant dense<0.000000e+00> : vector<16xf32>
    %228 = vector.multi_reduction <add>, %227, %cst_91 [1] : vector<16x16xf32> to vector<16xf32>
    %229 = vector.shape_cast %228 : vector<16xf32> to vector<16x1xf32>
    %230 = vector.broadcast %229 : vector<16x1xf32> to vector<16x16xf32>
    %231 = arith.divf %227, %230 : vector<16x16xf32>
    %cst_92 = arith.constant dense<0.000000e+00> : vector<16x8xf32>
    %232 = tpu.matmul %231, %217, %cst_92 {dimension_numbers = #tpu.dot_dimension_numbers<[1], [0], [0], [1], [0, 0, 1, 1], [], []>} : vector<16x16xf32>, vector<16x8xf32>, vector<16x8xf32> -> vector<16x8xf32>
    %233 = vector.extract_strided_slice %214 {offsets = [0, 8], sizes = [16, 8], strides = [1, 1]} : vector<16x96xf32> to vector<16x8xf32>
    %234 = vector.extract_strided_slice %214 {offsets = [0, 40], sizes = [16, 8], strides = [1, 1]} : vector<16x96xf32> to vector<16x8xf32>
    %235 = vector.extract_strided_slice %214 {offsets = [0, 72], sizes = [16, 8], strides = [1, 1]} : vector<16x96xf32> to vector<16x8xf32>
    %236 = tpu.transpose %234, [1, 0] : vector<16x8xf32> -> vector<8x16xf32>
    %cst_93 = arith.constant dense<0.000000e+00> : vector<16x16xf32>
    %237 = tpu.matmul %233, %236, %cst_93 {dimension_numbers = #tpu.dot_dimension_numbers<[1], [0], [0], [1], [0, 0, 1, 1], [], []>} : vector<16x8xf32>, vector<8x16xf32>, vector<16x16xf32> -> vector<16x16xf32>
    %cst_94 = arith.constant 0.353553385 : f32
    %238 = vector.broadcast %cst_94 : f32 to vector<16x16xf32>
    %239 = arith.mulf %237, %238 : vector<16x16xf32>
    %240 = arith.addf %239, %37 : vector<16x16xf32>
    %cst_95 = arith.constant dense<0xFF800000> : vector<16xf32>
    %241 = vector.multi_reduction <maximumf>, %240, %cst_95 [1] : vector<16x16xf32> to vector<16xf32>
    %242 = vector.shape_cast %241 : vector<16xf32> to vector<16x1xf32>
    %243 = vector.broadcast %242 : vector<16x1xf32> to vector<16x16xf32>
    %244 = arith.subf %240, %243 : vector<16x16xf32>
    %245 = math.exp %244 : vector<16x16xf32>
    %cst_96 = arith.constant dense<0.000000e+00> : vector<16xf32>
    %246 = vector.multi_reduction <add>, %245, %cst_96 [1] : vector<16x16xf32> to vector<16xf32>
    %247 = vector.shape_cast %246 : vector<16xf32> to vector<16x1xf32>
    %248 = vector.broadcast %247 : vector<16x1xf32> to vector<16x16xf32>
    %249 = arith.divf %245, %248 : vector<16x16xf32>
    %cst_97 = arith.constant dense<0.000000e+00> : vector<16x8xf32>
    %250 = tpu.matmul %249, %235, %cst_97 {dimension_numbers = #tpu.dot_dimension_numbers<[1], [0], [0], [1], [0, 0, 1, 1], [], []>} : vector<16x16xf32>, vector<16x8xf32>, vector<16x8xf32> -> vector<16x8xf32>
    %251 = vector.extract_strided_slice %214 {offsets = [0, 16], sizes = [16, 8], strides = [1, 1]} : vector<16x96xf32> to vector<16x8xf32>
    %252 = vector.extract_strided_slice %214 {offsets = [0, 48], sizes = [16, 8], strides = [1, 1]} : vector<16x96xf32> to vector<16x8xf32>
    %253 = vector.extract_strided_slice %214 {offsets = [0, 80], sizes = [16, 8], strides = [1, 1]} : vector<16x96xf32> to vector<16x8xf32>
    %254 = tpu.transpose %252, [1, 0] : vector<16x8xf32> -> vector<8x16xf32>
    %cst_98 = arith.constant dense<0.000000e+00> : vector<16x16xf32>
    %255 = tpu.matmul %251, %254, %cst_98 {dimension_numbers = #tpu.dot_dimension_numbers<[1], [0], [0], [1], [0, 0, 1, 1], [], []>} : vector<16x8xf32>, vector<8x16xf32>, vector<16x16xf32> -> vector<16x16xf32>
    %cst_99 = arith.constant 0.353553385 : f32
    %256 = vector.broadcast %cst_99 : f32 to vector<16x16xf32>
    %257 = arith.mulf %255, %256 : vector<16x16xf32>
    %258 = arith.addf %257, %37 : vector<16x16xf32>
    %cst_100 = arith.constant dense<0xFF800000> : vector<16xf32>
    %259 = vector.multi_reduction <maximumf>, %258, %cst_100 [1] : vector<16x16xf32> to vector<16xf32>
    %260 = vector.shape_cast %259 : vector<16xf32> to vector<16x1xf32>
    %261 = vector.broadcast %260 : vector<16x1xf32> to vector<16x16xf32>
    %262 = arith.subf %258, %261 : vector<16x16xf32>
    %263 = math.exp %262 : vector<16x16xf32>
    %cst_101 = arith.constant dense<0.000000e+00> : vector<16xf32>
    %264 = vector.multi_reduction <add>, %263, %cst_101 [1] : vector<16x16xf32> to vector<16xf32>
    %265 = vector.shape_cast %264 : vector<16xf32> to vector<16x1xf32>
    %266 = vector.broadcast %265 : vector<16x1xf32> to vector<16x16xf32>
    %267 = arith.divf %263, %266 : vector<16x16xf32>
    %cst_102 = arith.constant dense<0.000000e+00> : vector<16x8xf32>
    %268 = tpu.matmul %267, %253, %cst_102 {dimension_numbers = #tpu.dot_dimension_numbers<[1], [0], [0], [1], [0, 0, 1, 1], [], []>} : vector<16x16xf32>, vector<16x8xf32>, vector<16x8xf32> -> vector<16x8xf32>
    %269 = vector.extract_strided_slice %214 {offsets = [0, 24], sizes = [16, 8], strides = [1, 1]} : vector<16x96xf32> to vector<16x8xf32>
    %270 = vector.extract_strided_slice %214 {offsets = [0, 56], sizes = [16, 8], strides = [1, 1]} : vector<16x96xf32> to vector<16x8xf32>
    %271 = vector.extract_strided_slice %214 {offsets = [0, 88], sizes = [16, 8], strides = [1, 1]} : vector<16x96xf32> to vector<16x8xf32>
    %272 = tpu.transpose %270, [1, 0] : vector<16x8xf32> -> vector<8x16xf32>
    %cst_103 = arith.constant dense<0.000000e+00> : vector<16x16xf32>
    %273 = tpu.matmul %269, %272, %cst_103 {dimension_numbers = #tpu.dot_dimension_numbers<[1], [0], [0], [1], [0, 0, 1, 1], [], []>} : vector<16x8xf32>, vector<8x16xf32>, vector<16x16xf32> -> vector<16x16xf32>
    %cst_104 = arith.constant 0.353553385 : f32
    %274 = vector.broadcast %cst_104 : f32 to vector<16x16xf32>
    %275 = arith.mulf %273, %274 : vector<16x16xf32>
    %276 = arith.addf %275, %37 : vector<16x16xf32>
    %cst_105 = arith.constant dense<0xFF800000> : vector<16xf32>
    %277 = vector.multi_reduction <maximumf>, %276, %cst_105 [1] : vector<16x16xf32> to vector<16xf32>
    %278 = vector.shape_cast %277 : vector<16xf32> to vector<16x1xf32>
    %279 = vector.broadcast %278 : vector<16x1xf32> to vector<16x16xf32>
    %280 = arith.subf %276, %279 : vector<16x16xf32>
    %281 = math.exp %280 : vector<16x16xf32>
    %cst_106 = arith.constant dense<0.000000e+00> : vector<16xf32>
    %282 = vector.multi_reduction <add>, %281, %cst_106 [1] : vector<16x16xf32> to vector<16xf32>
    %283 = vector.shape_cast %282 : vector<16xf32> to vector<16x1xf32>
    %284 = vector.broadcast %283 : vector<16x1xf32> to vector<16x16xf32>
    %285 = arith.divf %281, %284 : vector<16x16xf32>
    %cst_107 = arith.constant dense<0.000000e+00> : vector<16x8xf32>
    %286 = tpu.matmul %285, %271, %cst_107 {dimension_numbers = #tpu.dot_dimension_numbers<[1], [0], [0], [1], [0, 0, 1, 1], [], []>} : vector<16x16xf32>, vector<16x8xf32>, vector<16x8xf32> -> vector<16x8xf32>
    %287 = tpu.concatenate %232, %250, %268, %286 in 1 : vector<16x8xf32>, vector<16x8xf32>, vector<16x8xf32>, vector<16x8xf32> -> vector<16x32xf32>
    %cst_108 = arith.constant dense<0.000000e+00> : vector<16x32xf32>
    %288 = tpu.matmul %287, %195, %cst_108 {dimension_numbers = #tpu.dot_dimension_numbers<[1], [0], [0], [1], [0, 0, 1, 1], [], []>} : vector<16x32xf32>, vector<32x32xf32>, vector<16x32xf32> -> vector<16x32xf32>
    %289 = vector.broadcast %206 : vector<1x32xf32> to vector<16x32xf32>
    %290 = arith.addf %288, %289 : vector<16x32xf32>
    %291 = arith.addf %191, %290 : vector<16x32xf32>
    %cst_109 = arith.constant dense<0.000000e+00> : vector<16xf32>
    %292 = vector.multi_reduction <add>, %291, %cst_109 [1] : vector<16x32xf32> to vector<16xf32>
    %293 = vector.shape_cast %292 : vector<16xf32> to vector<16x1xf32>
    %cst_110 = arith.constant 3.200000e+01 : f32
    %294 = vector.broadcast %cst_110 : f32 to vector<16x1xf32>
    %295 = arith.divf %293, %294 : vector<16x1xf32>
    %296 = vector.broadcast %295 : vector<16x1xf32> to vector<16x32xf32>
    %297 = arith.subf %291, %296 : vector<16x32xf32>
    %298 = arith.mulf %297, %297 : vector<16x32xf32>
    %cst_111 = arith.constant dense<0.000000e+00> : vector<16xf32>
    %299 = vector.multi_reduction <add>, %298, %cst_111 [1] : vector<16x32xf32> to vector<16xf32>
    %300 = vector.shape_cast %299 : vector<16xf32> to vector<16x1xf32>
    %cst_112 = arith.constant 3.200000e+01 : f32
    %301 = vector.broadcast %cst_112 : f32 to vector<16x1xf32>
    %302 = arith.divf %300, %301 : vector<16x1xf32>
    %303 = vector.broadcast %295 : vector<16x1xf32> to vector<16x32xf32>
    %304 = arith.subf %291, %303 : vector<16x32xf32>
    %cst_113 = arith.constant 9.99999974E-6 : f32
    %305 = vector.broadcast %cst_113 : f32 to vector<16x1xf32>
    %306 = arith.addf %302, %305 : vector<16x1xf32>
    %307 = math.rsqrt %306 : vector<16x1xf32>
    %308 = vector.broadcast %307 : vector<16x1xf32> to vector<16x32xf32>
    %309 = arith.mulf %304, %308 : vector<16x32xf32>
    %310 = vector.broadcast %207 : vector<1x32xf32> to vector<16x32xf32>
    %311 = arith.mulf %309, %310 : vector<16x32xf32>
    %312 = vector.broadcast %208 : vector<1x32xf32> to vector<16x32xf32>
    %313 = arith.addf %311, %312 : vector<16x32xf32>
    %cst_114 = arith.constant dense<0.000000e+00> : vector<16x64xf32>
    %314 = tpu.matmul %313, %197, %cst_114 {dimension_numbers = #tpu.dot_dimension_numbers<[1], [0], [0], [1], [0, 0, 1, 1], [], []>} : vector<16x32xf32>, vector<32x64xf32>, vector<16x64xf32> -> vector<16x64xf32>
    %315 = vector.broadcast %203 : vector<1x64xf32> to vector<16x64xf32>
    %316 = arith.addf %314, %315 : vector<16x64xf32>
    %cst_115 = arith.constant 0.000000e+00 : f32
    %317 = vector.broadcast %cst_115 : f32 to vector<16x64xf32>
    %318 = arith.maximumf %316, %317 : vector<16x64xf32>
    %cst_116 = arith.constant dense<0.000000e+00> : vector<16x32xf32>
    %319 = tpu.matmul %318, %199, %cst_116 {dimension_numbers = #tpu.dot_dimension_numbers<[1], [0], [0], [1], [0, 0, 1, 1], [], []>} : vector<16x64xf32>, vector<64x32xf32>, vector<16x32xf32> -> vector<16x32xf32>
    %320 = vector.broadcast %209 : vector<1x32xf32> to vector<16x32xf32>
    %321 = arith.addf %319, %320 : vector<16x32xf32>
    %322 = arith.addf %313, %321 : vector<16x32xf32>
    %cst_117 = arith.constant dense<0.000000e+00> : vector<16xf32>
    %323 = vector.multi_reduction <add>, %322, %cst_117 [1] : vector<16x32xf32> to vector<16xf32>
    %324 = vector.shape_cast %323 : vector<16xf32> to vector<16x1xf32>
    %cst_118 = arith.constant 3.200000e+01 : f32
    %325 = vector.broadcast %cst_118 : f32 to vector<16x1xf32>
    %326 = arith.divf %324, %325 : vector<16x1xf32>
    %327 = vector.broadcast %326 : vector<16x1xf32> to vector<16x32xf32>
    %328 = arith.subf %322, %327 : vector<16x32xf32>
    %329 = arith.mulf %328, %328 : vector<16x32xf32>
    %cst_119 = arith.constant dense<0.000000e+00> : vector<16xf32>
    %330 = vector.multi_reduction <add>, %329, %cst_119 [1] : vector<16x32xf32> to vector<16xf32>
    %331 = vector.shape_cast %330 : vector<16xf32> to vector<16x1xf32>
    %cst_120 = arith.constant 3.200000e+01 : f32
    %332 = vector.broadcast %cst_120 : f32 to vector<16x1xf32>
    %333 = arith.divf %331, %332 : vector<16x1xf32>
    %334 = vector.broadcast %326 : vector<16x1xf32> to vector<16x32xf32>
    %335 = arith.subf %322, %334 : vector<16x32xf32>
    %cst_121 = arith.constant 9.99999974E-6 : f32
    %336 = vector.broadcast %cst_121 : f32 to vector<16x1xf32>
    %337 = arith.addf %333, %336 : vector<16x1xf32>
    %338 = math.rsqrt %337 : vector<16x1xf32>
    %339 = vector.broadcast %338 : vector<16x1xf32> to vector<16x32xf32>
    %340 = arith.mulf %335, %339 : vector<16x32xf32>
    %341 = vector.broadcast %210 : vector<1x32xf32> to vector<16x32xf32>
    %342 = arith.mulf %340, %341 : vector<16x32xf32>
    %343 = vector.broadcast %211 : vector<1x32xf32> to vector<16x32xf32>
    %344 = arith.addf %342, %343 : vector<16x32xf32>
    %c0_122 = arith.constant 0 : index
    %c0_123 = arith.constant 0 : index
    %345 = vector.load %arg8[%c0_122, %c0_123] : memref<16x32xf32, #tpu.memory_space<vmem>>, vector<16x32xf32>
    tpu.vector_store %arg8[%c0_122, %c0_123], %344 {strides = array<i32>} : memref<16x32xf32, #tpu.memory_space<vmem>>, vector<16x32xf32>,
    return
  }
}

</mosaic_0001>

<bundles_post_ra>
// kernel: tpu_custom_call.1
= control target key start
LH: loop header
LB: loop body
LE: loop exit
PB: predicated region body
PF: predicated region fallthrough
CT: control target
= control target key end

     0   :  { %vm106_vm0 = vcmask 261120   ;;  %s3814_s0 = inlined_call_operand.vmem [shape: f32[16,32], index: 0, kind: input, shape index: {}]   ;;  %s3815_s1 = inlined_call_operand.vmem [shape: f32[2,32,96], index: 1, kind: input, shape index: {}]   ;;  %s3816_s2 = inlined_call_operand.vmem [shape: f32[2,32,32], index: 2, kind: input, shape index: {}]   ;;  %s3817_s3 = inlined_call_operand.vmem [shape: f32[2,32,64], index: 3, kind: input, shape index: {}]   ;;  %s3818_s4 = inlined_call_operand.vmem [shape: f32[2,64,32], index: 4, kind: input, shape index: {}]   ;;  %s3819_s5 = inlined_call_operand.vmem [shape: f32[2,1,96], index: 5, kind: input, shape index: {}]   ;;  %s3820_s6 = inlined_call_operand.vmem [shape: f32[2,1,64], index: 6, kind: input, shape index: {}]   ;;  %s3821_s7 = inlined_call_operand.vmem [shape: f32[2,6,32], index: 7, kind: input, shape index: {}]   ;;  %s3822_s8 = inlined_call_operand.hbm [shape: f32[16,32], index: 8, kind: output, shape index: {}]  }
   0x1   :  { %v80_v0 = vld [vmem:[%s3815_s1 + $0x18] sm:$0xff]  ;;  %v79_v1 = vld [vmem:[%s3815_s1 + $0x10] sm:$0xff]  ;;  %v3311_v2 = vld [vmem:[%s3814_s0] sm:$0xff] }
   0x2   :  { %2905 = vmatprep.subr.mxu1 %v80_v0  ;;  %v78_v3 = vld [vmem:[%s3815_s1 + $0x8] sm:$0xff]  ;;  %2913 = vmatprep.mubr.msk.f32.mxu1 %vm106_vm0, %v3311_v2 }
   0x3   :  { %2906 = vmatpush3.msra.mxu1 %v80_v0 }
   0x4   :  { %13 = vsyncpa [#allocation3], 0  ;;  %2907 = vmatprep.subr.mxu1 %v79_v1  ;;  %v77_v4 = vld [vmem:[%s3815_s1] sm:$0xff]  ;;  %v3324_v5 = vld [vmem:[%s3814_s0 + $0x8] sm:$0xff]  ;;  %vm194_vm1 = vcmask 64512   ;;  %s3240_s19 = smov 88   ;;  %v30_v17 = vlaneseq }
   0x5   :  { %2908 = vmatpush3.msra.mxu1 %v79_v1  ;;  %v2694_v6 = vld [vmem:[%s3819_s5] ss:$0 sm:$0xff]  ;;  %s3241_s0 = smov 96   ;;  %s3242_s20 = smov 120   ;;  %v3243_v25 = vmov -1e+30  }
   0x6   :  { %2909 = vmatprep.subr.mxu1 %v78_v3  ;;  %v3361_v18 = vshrl.u32 %v30_v17, 7  ;;  %v58_v20 = vand.u32 127, %v30_v17  ;;  %vm282_vm4 = vcmask 130048   ;;  %s3244_s21 = smov 64   ;;  %s3245_s22 = smov 56   ;;  %vm1032_vm5 = vcmask 195584  }
   0x7   :  { %2910 = vmatpush3.msra.mxu1 %v78_v3  ;;  %s3246_s23 = smov 80   ;;  %s3247_s24 = smov 112   ;;  %vm1254_vm6 = vcmask 523264  }
   0x8   :  { %2911 = vmatprep.subr.mxu1 %v77_v4  ;;  %v32_v19 = vadd.s32 8, %v3361_v18  ;;  %v63_v22 = vand.u32 1, %v58_v20  ;;  %v37_v23 = vand.u32 1, %v3361_v18  ;;  %s3248_s25 = smov 48   ;;  %s3249_s26 = smov 72  }
   0x9   :  { %2912 = vmatpush3.msra.mxu1 %v77_v4  ;;  %s3250_s27 = smov 104   ;;  %s3251_s28 = smov 40  }
   0xa   :  { %2914 = vmatmul.mubr.msk.f32.vlgmr.msra.gmra.mxu1 %vm106_vm0, %v3324_v5  ;;  %v44_v21 = vand.u32 1, %v32_v19  ;;  %vm71_vm3 = vcmp.eq.s32.totalorder %v37_v23, %v63_v22  ;;  %s3252_s29 = smov 8   ;;  %s3253_s30 = smov 16  }
   0xb   :  { %v3367_v29 = vsel %vm71_vm3, 0.0, %v3243_v25  ;;  %s3254_s17 = smov 24  }
   0xc   :  { %vm72_vm2 = vcmp.eq.s32.totalorder %v44_v21, %v63_v22 }
   0xd   :  { %v3365_v26 = vsel %vm72_vm2, 0.0, %v3243_v25 }
  0xca   :  { %v2915_v7 = vpop.f32.mrf.mxu1 }
  0xcb   :  { %v3331_v8 = vadd.f32 %v2915_v7, %v2694_v6 }
  0xcc   :  { %v179_v9 = vpop.f32.mrf.mxu1 }
  0xcd   :  { %v3333_v10 = vadd.f32 %v2694_v6, %v179_v9  ;;  %398 = vrot.lane.b32.xlu1 %v3331_v8, %s3240_s19  ;;  %192 = vrot.lane.b32.xlu0 %v3331_v8, %s3241_s0 }
  0xcf   :  { %2920 = vmatprep.mubr.msk.f32.mxu1 %vm194_vm1, %v3333_v10 }
  0xd1   :  { %396 = vrot.lane.b32.xlu1 %v3333_v10, %s3240_s19  ;;  %190 = vrot.lane.b32.xlu0 %v3333_v10, %s3241_s0 }
  0xd5   :  { %394 = vrot.lane.b32.xlu1 %v3331_v8, %s3242_s20  ;;  %392 = vrot.lane.b32.xlu0 %v3333_v10, %s3242_s20 }
 0x13f   :  { %v193_v11 = vpop.permute.xlu0 %192  ;;  %v399_v12 = vpop.permute.xlu1 %398 }
 0x140   :  { %2916 = vmatprep.subr.msk.mxu1 %vm194_vm1, %v193_v11 }
 0x141   :  { %2917 = vmatpush3.xpose.msk.msra.mxu1 %vm194_vm1, %v193_v11 }
 0x143   :  { %v191_v13 = vpop.permute.xlu0 %190  ;;  %v397_v15 = vpop.permute.xlu1 %396 }
 0x144   :  { %2918 = vmatprep.subr.msk.mxu1 %vm194_vm1, %v191_v13 }
 0x145   :  { %2919 = vmatpush3.xpose.msk.msra.mxu1 %vm194_vm1, %v191_v13 }
 0x146   :  { %2930 = vmatprep.subr.msk.mxu1 %vm194_vm1, %v399_v12 }
 0x147   :  { %v393_v14 = vpop.permute.xlu0 %392  ;;  %v395_v16 = vpop.permute.xlu1 %394 }
 0x148   :  { %2921 = vmatmul.mubr.msk.f32.vlgmr.msra.gmra.mxu1 %vm194_vm1, %v3331_v8 }
 0x149   :  { %2931 = vmatpush3.xpose.msk.msra.mxu1 %vm194_vm1, %v399_v12  ;;  %2934 = vmatprep.mubr.msk.f32.mxu1 %vm194_vm1, %v393_v14 }
 0x14a   :  { %2932 = vmatprep.subr.msk.mxu1 %vm194_vm1, %v397_v15 }
 0x14d   :  { %2933 = vmatpush3.xpose.msk.msra.mxu1 %vm194_vm1, %v397_v15 }
 0x150   :  { %2935 = vmatmul.mubr.msk.f32.vlgmr.msra.gmra.mxu1 %vm194_vm1, %v395_v16 }
 0x208   :  { %v2922_v24 = vpop.f32.mrf.mxu1 }
 0x209   :  { %v279_v27 = vmul.f32 0.35355338, %v2922_v24 }
 0x20a   :  { %v269_v28 = vpop.f32.mrf.mxu1 }
 0x20b   :  { %v278_v30 = vmul.f32 0.35355338, %v269_v28  ;;  %v281_v31 = vadd.f32 %v279_v27, %v3365_v26 }
 0x20d   :  { %v286_v32 = vsel %vm282_vm4, %v281_v31, -inf  ;;  %v280_v33 = vadd.f32 %v278_v30, %v3367_v29 }
 0x20e   :  { %287 = vmax.xlane.f32.xlu1 %v286_v32 }
 0x20f   :  { %v283_v34 = vsel %vm282_vm4, %v280_v33, -inf }
 0x210   :  { %v2936_v35 = vpop.f32.mrf.mxu1  ;;  %284 = vmax.xlane.f32.xlu0 %v283_v34 }
 0x211   :  { %v484_v37 = vmul.f32 0.35355338, %v2936_v35 }
 0x212   :  { %v474_v36 = vpop.f32.mrf.mxu1 }
 0x213   :  { %v483_v38 = vmul.f32 0.35355338, %v474_v36  ;;  %v486_v41 = vadd.f32 %v484_v37, %v3365_v26 }
 0x215   :  { %v485_v39 = vadd.f32 %v483_v38, %v3367_v29  ;;  %v490_v42 = vsel %vm282_vm4, %v486_v41, -inf }
 0x217   :  { %v487_v40 = vsel %vm282_vm4, %v485_v39, -inf }
 0x218   :  { %488 = vmax.xlane.f32.xlu0 %v487_v40 }
 0x21c   :  { %491 = vmax.xlane.f32.xlu0 %v490_v42 }
 0x21f   :  { %307 = vrot.lane.b32.xlu1 %v3331_v8, %s3244_s21 }
 0x223   :  { %511 = vrot.lane.b32.xlu1 %v3331_v8, %s3245_s22 }
 0x227   :  { %509 = vrot.lane.b32.xlu1 %v3333_v10, %s3245_s22 }
 0x232   :  { %305 = vrot.lane.b32.xlu0 %v3333_v10, %s3244_s21 }
 0x297   :  { %v288_v43 = vpop.xlane.xlu1 %287 }
 0x298   :  { %v290_v44 = vsub.f32 %v281_v31, %v288_v43 }
 0x299   :  { %v285_v45 = vpop.xlane.xlu0 %284 }
 0x29a   :  { %v293_v46 = vmul.f32 1.442695, %v290_v44  ;;  %v289_v47 = vsub.f32 %v280_v33, %v285_v45 }
 0x29b   :  { %v308_v48 = vpop.permute.xlu1 %307 }
 0x29c   :  { %3138 = vpow2.f32 %v293_v46  ;;  %v291_v49 = vmul.f32 1.442695, %v289_v47  ;;  %2923 = vmatprep.subr.mxu0 %v308_v48 }
 0x29d   :  { %2924 = vmatpush3.msra.mxu0 %v308_v48 }
 0x29e   :  { %3140 = vpow2.f32 %v291_v49 }
 0x29f   :  { %v512_v58 = vpop.permute.xlu1 %511 }
 0x2a1   :  { %v489_v50 = vpop.xlane.xlu0 %488 }
 0x2a2   :  { %v493_v62 = vsub.f32 %v485_v39, %v489_v50 }
 0x2a3   :  { %v510_v3 = vpop.permute.xlu1 %509 }
 0x2a4   :  { %v495_v63 = vmul.f32 1.442695, %v493_v62 }
 0x2a5   :  { %v492_v51 = vpop.xlane.xlu0 %491 }
 0x2a6   :  { %v494_v52 = vsub.f32 %v486_v41, %v492_v51 }
 0x2a8   :  { %v497_v53 = vmul.f32 1.442695, %v494_v52 }
 0x2a9   :  { %v3139_v54 = vpop.eup %3138  ;;  %v306_v55 = vpop.permute.xlu0 %305 }
 0x2aa   :  { %3142 = vpow2.f32 %v497_v53  ;;  %2925 = vmatprep.subr.mxu0 %v306_v55  ;;  %v298_v56 = vsel %vm282_vm4, %v3139_v54, 0.0 }
 0x2ab   :  { %v3141_v57 = vpop.eup %3140  ;;  %299 = vadd.xlane.f32.xlu0 %v298_v56  ;;  %2926 = vmatpush3.msra.mxu0 %v306_v55  ;;  %3144 = vpow2.f32 %v495_v63 }
 0x2ac   :  { %2937 = vmatprep.subr.mxu0 %v512_v58  ;;  %v295_v59 = vsel %vm282_vm4, %v3141_v57, 0.0 }
 0x2ad   :  { %296 = vadd.xlane.f32.xlu1 %v295_v59 }
 0x2b7   :  { %v3143_v60 = vpop.eup %3142 }
 0x2b8   :  { %v502_v61 = vsel %vm282_vm4, %v3143_v60, 0.0  ;;  %v3145_v0 = vpop.eup %3144 }
 0x2b9   :  { %503 = vadd.xlane.f32.xlu0 %v502_v61  ;;  %v499_v1 = vsel %vm282_vm4, %v3145_v0, 0.0 }
 0x2be   :  { %600 = vrot.lane.b32.xlu1 %v3333_v10, %s3246_s23 }
 0x2cf   :  { %602 = vrot.lane.b32.xlu0 %v3331_v8, %s3246_s23 }
 0x2d3   :  { %596 = vrot.lane.b32.xlu0 %v3333_v10, %s3247_s24 }
 0x2e2   :  { %500 = vadd.xlane.f32.xlu1 %v499_v1 }
 0x2f3   :  { %598 = vrot.lane.b32.xlu1 %v3331_v8, %s3247_s24 }
 0x334   :  { %v300_v4 = vpop.xlane.xlu0 %299 }
 0x335   :  { %3146 = vrcp.f32 %v300_v4 }
 0x336   :  { %v297_v6 = vpop.xlane.xlu1 %296 }
 0x337   :  { %3148 = vrcp.f32 %v297_v6 }
 0x33a   :  { %v601_v15 = vpop.permute.xlu1 %600 }
 0x342   :  { %v3147_v7 = vpop.eup %3146  ;;  %v504_v11 = vpop.xlane.xlu0 %503 }
 0x343   :  { %v304_v13 = vmul.f32 %v3147_v7, %v3139_v54  ;;  %3150 = vrcp.f32 %v504_v11 }
 0x344   :  { %v3149_v9 = vpop.eup %3148 }
 0x345   :  { %v302_v12 = vmul.f32 %v3149_v9, %v3141_v57 }
 0x346   :  { %v603_v14 = vpop.permute.xlu0 %602 }
 0x347   :  { %2927 = vmatprep.mubr.msk.f32.mxu0 %vm282_vm4, %v302_v12 }
 0x348   :  { %2928 = vmatmul.mubr.msk.f32.vlgmr.msra.gmra.mxu0 %vm282_vm4, %v304_v13 }
 0x349   :  { %2938 = vmatpush3.msra.mxu0 %v512_v58 }
 0x34a   :  { %2939 = vmatprep.subr.mxu0 %v510_v3  ;;  %v597_v22 = vpop.permute.xlu0 %596 }
 0x34b   :  { %2940 = vmatpush3.msra.mxu0 %v510_v3 }
 0x34c   :  { %2944 = vmatprep.subr.msk.mxu0 %vm194_vm1, %v603_v14 }
 0x350   :  { %v3151_v17 = vpop.eup %3150 }
 0x351   :  { %v508_v21 = vmul.f32 %v3151_v17, %v3143_v60 }
 0x36b   :  { %v501_v16 = vpop.xlane.xlu1 %500 }
 0x36c   :  { %3152 = vrcp.f32 %v501_v16 }
 0x36f   :  { %v599_v23 = vpop.permute.xlu1 %598 }
 0x379   :  { %v3153_v19 = vpop.eup %3152 }
 0x37a   :  { %v506_v20 = vmul.f32 %v3153_v19, %v3145_v0 }
 0x37c   :  { %2941 = vmatprep.mubr.msk.f32.mxu0 %vm282_vm4, %v506_v20 }
 0x37d   :  { %2942 = vmatmul.mubr.msk.f32.vlgmr.msra.gmra.mxu0 %vm282_vm4, %v508_v21 }
 0x37e   :  { %2945 = vmatpush3.xpose.msk.msra.mxu0 %vm194_vm1, %v603_v14  ;;  %2948 = vmatprep.mubr.msk.f32.mxu0 %vm194_vm1, %v597_v22 }
 0x37f   :  { %2946 = vmatprep.subr.msk.mxu0 %vm194_vm1, %v601_v15 }
 0x382   :  { %2947 = vmatpush3.xpose.msk.msra.mxu0 %vm194_vm1, %v601_v15 }
 0x385   :  { %2949 = vmatmul.mubr.msk.f32.vlgmr.msra.gmra.mxu0 %vm194_vm1, %v599_v23 }
 0x408   :  { %v3407_v24 = vpop.f32.mrf.mxu0 }
 0x40a   :  { %v3409_v25 = vpop.f32.mrf.mxu0 }
 0x43d   :  { %v3411_v27 = vpop.f32.mrf.mxu0 }
 0x43f   :  { %v3413_v28 = vpop.f32.mrf.mxu0 }
 0x445   :  { %v2950_v30 = vpop.f32.mrf.mxu0 }
 0x446   :  { %v688_v31 = vmul.f32 0.35355338, %v2950_v30 }
 0x447   :  { %v678_v32 = vpop.f32.mrf.mxu0 }
 0x448   :  { %v687_v33 = vmul.f32 0.35355338, %v678_v32  ;;  %v690_v34 = vadd.f32 %v688_v31, %v3365_v26  ;;  %v83_v32 = vld [vmem:[%s3816_s2 + $0x10] sm:$0xff] }
 0x44a   :  { %v694_v35 = vsel %vm282_vm4, %v690_v34, -inf  ;;  %v689_v36 = vadd.f32 %v687_v33, %v3367_v29  ;;  %v82_v33 = vld [vmem:[%s3816_s2 + $0x8] sm:$0xff] }
 0x44b   :  { %695 = vmax.xlane.f32.xlu1 %v694_v35 }
 0x44c   :  { %v691_v37 = vsel %vm282_vm4, %v689_v36, -inf }
 0x44d   :  { %692 = vmax.xlane.f32.xlu0 %v691_v37 }
 0x45c   :  { %715 = vrot.lane.b32.xlu1 %v3331_v8, %s3248_s25 }
 0x460   :  { %806 = vrot.lane.b32.xlu1 %v3331_v8, %s3249_s26 }
 0x464   :  { %804 = vrot.lane.b32.xlu1 %v3333_v10, %s3249_s26 }
 0x468   :  { %802 = vrot.lane.b32.xlu1 %v3331_v8, %s3250_s27 }
 0x4d4   :  { %v696_v38 = vpop.xlane.xlu1 %695 }
 0x4d5   :  { %v698_v39 = vsub.f32 %v690_v34, %v696_v38  ;;  %v81_v34 = vld [vmem:[%s3816_s2] sm:$0xff] }
 0x4d6   :  { %v693_v40 = vpop.xlane.xlu0 %692 }
 0x4d7   :  { %v701_v41 = vmul.f32 1.442695, %v698_v39  ;;  %v697_v42 = vsub.f32 %v689_v36, %v693_v40 }
 0x4d8   :  { %v716_v43 = vpop.permute.xlu1 %715 }
 0x4d9   :  { %3154 = vpow2.f32 %v701_v41  ;;  %v699_v44 = vmul.f32 1.442695, %v697_v42  ;;  %2951 = vmatprep.subr.mxu1 %v716_v43 }
 0x4da   :  { %2952 = vmatpush3.msra.mxu1 %v716_v43 }
 0x4db   :  { %3156 = vpow2.f32 %v699_v44 }
 0x4dc   :  { %v807_v52 = vpop.permute.xlu1 %806 }
 0x4e0   :  { %v805_v58 = vpop.permute.xlu1 %804 }
 0x4e4   :  { %v803_v59 = vpop.permute.xlu1 %802 }
 0x4e6   :  { %v3155_v45 = vpop.eup %3154 }
 0x4e7   :  { %v706_v46 = vsel %vm282_vm4, %v3155_v45, 0.0 }
 0x4e8   :  { %v3157_v47 = vpop.eup %3156  ;;  %707 = vadd.xlane.f32.xlu0 %v706_v46 }
 0x4e9   :  { %v703_v48 = vsel %vm282_vm4, %v3157_v47, 0.0 }
 0x4ec   :  { %704 = vadd.xlane.f32.xlu0 %v703_v48 }
 0x502   :  { %713 = vrot.lane.b32.xlu0 %v3333_v10, %s3248_s25 }
 0x506   :  { %800 = vrot.lane.b32.xlu0 %v3333_v10, %s3250_s27 }
 0x571   :  { %v708_v49 = vpop.xlane.xlu0 %707 }
 0x572   :  { %3158 = vrcp.f32 %v708_v49  ;;  %v3487_v49 = vld [vmem:[%s3821_s7] sm:$0x3f] }
 0x575   :  { %v705_v50 = vpop.xlane.xlu0 %704 }
 0x576   :  { %3160 = vrcp.f32 %v705_v50 }
 0x579   :  { %v714_v51 = vpop.permute.xlu0 %713 }
 0x57a   :  { %2953 = vmatprep.subr.mxu1 %v714_v51 }
 0x57b   :  { %2954 = vmatpush3.msra.mxu1 %v714_v51 }
 0x57c   :  { %2958 = vmatprep.subr.msk.mxu1 %vm194_vm1, %v807_v52 }
 0x57d   :  { %v801_v57 = vpop.permute.xlu0 %800 }
 0x57f   :  { %v3159_v53 = vpop.eup %3158 }
 0x580   :  { %v712_v56 = vmul.f32 %v3159_v53, %v3155_v45 }
 0x583   :  { %v3161_v54 = vpop.eup %3160 }
 0x584   :  { %v710_v55 = vmul.f32 %v3161_v54, %v3157_v47 }
 0x586   :  { %2955 = vmatprep.mubr.msk.f32.mxu1 %vm282_vm4, %v710_v55 }
 0x587   :  { %2956 = vmatmul.mubr.msk.f32.vlgmr.msra.gmra.mxu1 %vm282_vm4, %v712_v56 }
 0x588   :  { %2959 = vmatpush3.xpose.msk.msra.mxu1 %vm194_vm1, %v807_v52  ;;  %2962 = vmatprep.mubr.msk.f32.mxu1 %vm194_vm1, %v801_v57 }
 0x589   :  { %2960 = vmatprep.subr.msk.mxu1 %vm194_vm1, %v805_v58 }
 0x58c   :  { %2961 = vmatpush3.xpose.msk.msra.mxu1 %vm194_vm1, %v805_v58 }
 0x58f   :  { %2963 = vmatmul.mubr.msk.f32.vlgmr.msra.gmra.mxu1 %vm194_vm1, %v803_v59 }
 0x647   :  { %v2957_v60 = vpop.f32.mrf.mxu1 }
 0x649   :  { %v791_v61 = vpop.f32.mrf.mxu1 }
 0x64f   :  { %v2964_v62 = vpop.f32.mrf.mxu1 }
 0x650   :  { %v892_v63 = vmul.f32 0.35355338, %v2964_v62 }
 0x651   :  { %v882_v0 = vpop.f32.mrf.mxu1 }
 0x652   :  { %v891_v1 = vmul.f32 0.35355338, %v882_v0  ;;  %v894_v3 = vadd.f32 %v892_v63, %v3365_v26 }
 0x654   :  { %v898_v4 = vsel %vm282_vm4, %v894_v3, -inf  ;;  %v893_v6 = vadd.f32 %v891_v1, %v3367_v29 }
 0x655   :  { %899 = vmax.xlane.f32.xlu1 %v898_v4  ;;  %v87_v4 = vld [vmem:[%s3817_s3 + $0x10] sm:$0xff] }
 0x656   :  { %v895_v7 = vsel %vm282_vm4, %v893_v6, -inf }
 0x657   :  { %896 = vmax.xlane.f32.xlu0 %v895_v7  ;;  %v85_v7 = vld [vmem:[%s3817_s3] sm:$0xff] }
 0x666   :  { %919 = vrot.lane.b32.xlu1 %v3331_v8, %s3251_s28 }
 0x66a   :  { %1006 = vrot.lane.b32.xlu1 %v3413_v28, %s3252_s29 }
 0x66e   :  { %1008 = vrot.lane.b32.xlu1 %v3411_v27, %s3252_s29 }
 0x672   :  { %1016 = vrot.lane.b32.xlu1 %v2957_v60, %s3253_s30 }
 0x6de   :  { %v900_v9 = vpop.xlane.xlu1 %899 }
 0x6df   :  { %v902_v11 = vsub.f32 %v894_v3, %v900_v9  ;;  %v96_v9 = vld [vmem:[%s3818_s4 + $0x38] sm:$0xff] }
 0x6e0   :  { %v897_v12 = vpop.xlane.xlu0 %896 }
 0x6e1   :  { %v905_v13 = vmul.f32 1.442695, %v902_v11  ;;  %v901_v14 = vsub.f32 %v893_v6, %v897_v12  ;;  %v86_v6 = vld [vmem:[%s3817_s3 + $0x8] sm:$0xff]  ;;  %v95_v11 = vld [vmem:[%s3818_s4 + $0x30] sm:$0xff] }
 0x6e2   :  { %v920_v15 = vpop.permute.xlu1 %919  ;;  %v94_v12 = vld [vmem:[%s3818_s4 + $0x28] sm:$0xff] }
 0x6e3   :  { %3162 = vpow2.f32 %v905_v13  ;;  %v903_v16 = vmul.f32 1.442695, %v901_v14  ;;  %2965 = vmatprep.subr.mxu0 %v920_v15  ;;  %v93_v13 = vld [vmem:[%s3818_s4 + $0x20] sm:$0xff] }
 0x6e4   :  { %2966 = vmatpush3.msra.mxu0 %v920_v15 }
 0x6e5   :  { %3164 = vpow2.f32 %v903_v16 }
 0x6e6   :  { %v1007_v37 = vpop.permute.xlu1 %1006 }
 0x6e7   :  { %v1028_v41 = vsel %vm194_vm1, %v3409_v25, %v1007_v37  ;;  %v1037_v25 = vsub.s32 0, %v3361_v18  ;;  %v90_v37 = vld [vmem:[%s3818_s4 + $0x8] sm:$0xff] }
 0x6ea   :  { %v1009_v38 = vpop.permute.xlu1 %1008 }
 0x6eb   :  { %v1029_v43 = vsel %vm194_vm1, %v3407_v24, %v1009_v38  ;;  %v1038_v24 = vrot.slane %v3487_v49, %v1037_v25  ;;  %v89_v38 = vld [vmem:[%s3818_s4] sm:$0xff] }
 0x6ee   :  { %v1017_v39 = vpop.permute.xlu1 %1016 }
 0x6ef   :  { %v1031_v46 = vsel %vm282_vm4, %v1029_v43, %v1017_v39  ;;  %v2723_v39 = vld [vmem:[%s3820_s6] ss:$0 sm:$0xff] }
 0x6f0   :  { %v3163_v8 = vpop.eup %3162 }
 0x6f1   :  { %v910_v17 = vsel %vm282_vm4, %v3163_v8, 0.0 }
 0x6f2   :  { %v3165_v19 = vpop.eup %3164  ;;  %911 = vadd.xlane.f32.xlu0 %v910_v17 }
 0x6f3   :  { %v907_v20 = vsel %vm282_vm4, %v3165_v19, 0.0 }
 0x6f6   :  { %908 = vadd.xlane.f32.xlu0 %v907_v20  ;;  %v1151_v20 = vsub.s32 1, %v3361_v18 }
 0x70c   :  { %917 = vrot.lane.b32.xlu0 %v3333_v10, %s3251_s28  ;;  %v84_v10 = vld [vmem:[%s3816_s2 + $0x18] sm:$0xff] }
 0x710   :  { %1014 = vrot.lane.b32.xlu0 %v791_v61, %s3253_s30 }
 0x77b   :  { %v912_v21 = vpop.xlane.xlu0 %911 }
 0x77c   :  { %3166 = vrcp.f32 %v912_v21  ;;  %v1157_v21 = vsub.s32 2, %v3361_v18 }
 0x77f   :  { %v909_v22 = vpop.xlane.xlu0 %908 }
 0x780   :  { %3168 = vrcp.f32 %v909_v22  ;;  %v1152_v22 = vrot.slane %v3487_v49, %v1151_v20 }
 0x783   :  { %v918_v23 = vpop.permute.xlu0 %917 }
 0x784   :  { %2967 = vmatprep.subr.mxu0 %v918_v23 }
 0x785   :  { %2968 = vmatpush3.msra.mxu0 %v918_v23 }
 0x786   :  { %2972 = vmatprep.subr.mxu0 %v84_v10 }
 0x787   :  { %v1015_v40 = vpop.permute.xlu0 %1014 }
 0x788   :  { %v1030_v44 = vsel %vm282_vm4, %v1028_v41, %v1015_v40 }
 0x789   :  { %v3167_v27 = vpop.eup %3166 }
 0x78a   :  { %v916_v31 = vmul.f32 %v3167_v27, %v3163_v8 }
 0x78d   :  { %v3169_v28 = vpop.eup %3168 }
 0x78e   :  { %v914_v30 = vmul.f32 %v3169_v28, %v3165_v19  ;;  %v1158_v28 = vrot.slane %v3487_v49, %v1157_v21 }
 0x790   :  { %2969 = vmatprep.mubr.msk.f32.mxu0 %vm282_vm4, %v914_v30 }
 0x791   :  { %2970 = vmatmul.mubr.msk.f32.vlgmr.msra.gmra.mxu0 %vm282_vm4, %v916_v31 }
 0x792   :  { %2973 = vmatpush3.msra.mxu0 %v84_v10 }
 0x793   :  { %2974 = vmatprep.subr.mxu0 %v83_v32 }
 0x794   :  { %2975 = vmatpush3.msra.mxu0 %v83_v32 }
 0x795   :  { %2976 = vmatprep.subr.mxu0 %v82_v33 }
 0x796   :  { %2977 = vmatpush3.msra.mxu0 %v82_v33 }
 0x797   :  { %2978 = vmatprep.subr.mxu0 %v81_v34 }
 0x798   :  { %2979 = vmatpush3.msra.mxu0 %v81_v34 }
 0x799   :  { %2994 = vmatprep.subr.mxu0 %v96_v9 }
 0x851   :  { %v2971_v35 = vpop.f32.mrf.mxu0 }
 0x852   :  { %1024 = vrot.lane.b32.xlu1 %v2971_v35, %s3254_s17  ;;  %v92_v35 = vld [vmem:[%s3818_s4 + $0x18] sm:$0xff] }
 0x853   :  { %v995_v36 = vpop.f32.mrf.mxu0 }
 0x854   :  { %1022 = vrot.lane.b32.xlu0 %v995_v36, %s3254_s17  ;;  %v91_v36 = vld [vmem:[%s3818_s4 + $0x10] sm:$0xff] }
 0x8c4   :  { %v1025_v42 = vpop.permute.xlu1 %1024 }
 0x8c5   :  { %v1034_v48 = vsel %vm1032_vm5, %v1031_v46, %v1025_v42  ;;  %v1252_v46 = vsub.s32 3, %v3361_v18 }
 0x8c6   :  { %v1023_v45 = vpop.permute.xlu0 %1022 }
 0x8c7   :  { %v1033_v47 = vsel %vm1032_vm5, %v1030_v44, %v1023_v45 }
 0x8c8   :  { %2980 = vmatprep.mubr.msk.f32.mxu0 %vm106_vm0, %v1033_v47  ;;  %v1253_v47 = vrot.slane %v3487_v49, %v1252_v46 }
 0x8c9   :  { %2981 = vmatmul.mubr.msk.f32.vlgmr.msra.gmra.mxu0 %vm106_vm0, %v1034_v48 }
 0x8ca   :  { %2995 = vmatpush3.msra.mxu0 %v96_v9 }
 0x8cb   :  { %2996 = vmatprep.subr.mxu0 %v95_v11 }
 0x8cc   :  { %2997 = vmatpush3.msra.mxu0 %v95_v11 }
 0x8cd   :  { %2998 = vmatprep.subr.mxu0 %v94_v12 }
 0x8ce   :  { %2999 = vmatpush3.msra.mxu0 %v94_v12 }
 0x8cf   :  { %3000 = vmatprep.subr.mxu0 %v93_v13 }
 0x8d0   :  { %3001 = vmatpush3.msra.mxu0 %v93_v13 }
 0x8d1   :  { %3002 = vmatprep.subr.mxu0 %v92_v35 }
 0x8d2   :  { %3003 = vmatpush3.msra.mxu0 %v92_v35 }
 0x8d3   :  { %3004 = vmatprep.subr.mxu0 %v91_v36 }
 0x8d4   :  { %3005 = vmatpush3.msra.mxu0 %v91_v36 }
 0x8d5   :  { %3006 = vmatprep.subr.mxu0 %v90_v37 }
 0x8d6   :  { %3007 = vmatpush3.msra.mxu0 %v90_v37 }
 0x8d7   :  { %3008 = vmatprep.subr.mxu0 %v89_v38 }
 0x8d8   :  { %3009 = vmatpush3.msra.mxu0 %v89_v38 }
 0x989   :  { %v2982_v50 = vpop.f32.mrf.mxu0 }
 0x98a   :  { %v1117_v51 = vadd.f32 %v2982_v50, %v1038_v24 }
 0x98b   :  { %v1111_v52 = vpop.f32.mrf.mxu0 }
 0x98c   :  { %v1112_v53 = vadd.f32 %v1111_v52, %v1038_v24  ;;  %v1121_v54 = vadd.f32 %v1117_v51, %v3324_v5 }
 0x98e   :  { %v1125_v55 = vsel %vm106_vm0, %v1121_v54, 0.0  ;;  %v1120_v56 = vadd.f32 %v1112_v53, %v3311_v2  ;;  %v88_v2 = vld [vmem:[%s3817_s3 + $0x18] sm:$0xff] }
 0x98f   :  { %1126 = vadd.xlane.f32.xlu1 %v1125_v55  ;;  %2983 = vmatprep.subr.mxu1 %v88_v2 }
 0x990   :  { %v1122_v57 = vsel %vm106_vm0, %v1120_v56, 0.0  ;;  %2984 = vmatpush3.msra.mxu1 %v88_v2  ;;  %v2729_v2 = vld [vmem:[%s3815_s1 + $0x28] sm:$0xff] }
 0x991   :  { %1123 = vadd.xlane.f32.xlu0 %v1122_v57  ;;  %2985 = vmatprep.subr.mxu1 %v87_v4 }
 0x992   :  { %2986 = vmatpush3.msra.mxu1 %v87_v4  ;;  %v2728_v4 = vld [vmem:[%s3815_s1 + $0x20] sm:$0xff] }
 0x993   :  { %2987 = vmatprep.subr.mxu1 %v86_v6 }
 0x994   :  { %2988 = vmatpush3.msra.mxu1 %v86_v6 }
 0x995   :  { %2989 = vmatprep.subr.mxu1 %v85_v7 }
 0x996   :  { %2990 = vmatpush3.msra.mxu1 %v85_v7 }
 0xa18   :  { %v1127_v58 = vpop.xlane.xlu1 %1126 }
 0xa19   :  { %v1130_v59 = vmul.f32 0.03125, %v1127_v58 }
 0xa1a   :  { %v1124_v60 = vpop.xlane.xlu0 %1123 }
 0xa1b   :  { %v1129_v61 = vmul.f32 0.03125, %v1124_v60  ;;  %v1132_v62 = vsub.f32 %v1121_v54, %v1130_v59 }
 0xa1d   :  { %v1131_v63 = vsub.f32 %v1120_v56, %v1129_v61  ;;  %v1134_v3 = vmul.f32 %v1132_v62, %v1132_v62 }
 0xa1f   :  { %v1133_v0 = vmul.f32 %v1131_v63, %v1131_v63  ;;  %v1138_v5 = vsel %vm106_vm0, %v1134_v3, 0.0  ;;  %v2731_v3 = vld [vmem:[%s3815_s1 + $0x38] sm:$0xff] }
 0xa20   :  { %3013 = vmatprep.subr.mxu1 %v2731_v3 }
 0xa21   :  { %v1135_v1 = vsel %vm106_vm0, %v1133_v0, 0.0 }
 0xa22   :  { %1136 = vadd.xlane.f32.xlu0 %v1135_v1 }
 0xa26   :  { %1139 = vadd.xlane.f32.xlu0 %v1138_v5  ;;  %v2730_v5 = vld [vmem:[%s3815_s1 + $0x30] sm:$0xff] }
 0xaab   :  { %v1137_v14 = vpop.xlane.xlu0 %1136 }
 0xaac   :  { %v1141_v15 = vmul.f32 0.03125, %v1137_v14  ;;  %v1366_v14 = vsub.s32 4, %v3361_v18 }
 0xaae   :  { %v1143_v16 = vadd.f32 1e-05, %v1141_v15 }
 0xaaf   :  { %v1140_v8 = vpop.xlane.xlu0 %1139 }
 0xab0   :  { %3170 = vrsqrt.f32 %v1143_v16  ;;  %v1142_v17 = vmul.f32 0.03125, %v1140_v8  ;;  %v1367_v16 = vrot.slane %v3487_v49, %v1366_v14  ;;  %v1372_v8 = vsub.s32 5, %v3361_v18 }
 0xab2   :  { %v1144_v19 = vadd.f32 1e-05, %v1142_v17 }
 0xab4   :  { %3172 = vrsqrt.f32 %v1144_v19 }
 0xabd   :  { %v3171_v23 = vpop.eup %3170 }
 0xabe   :  { %v1147_v27 = vmul.f32 %v3171_v23, %v1131_v63 }
 0xac0   :  { %v1153_v30 = vmul.f32 %v1152_v22, %v1147_v27  ;;  %v1373_v27 = vrot.slane %v3487_v49, %v1372_v8 }
 0xac1   :  { %v3173_v31 = vpop.eup %3172 }
 0xac2   :  { %v1148_v10 = vmul.f32 %v3173_v31, %v1132_v62  ;;  %v1159_v32 = vadd.f32 %v1158_v28, %v1153_v30 }
 0xac4   :  { %v1154_v33 = vmul.f32 %v1152_v22, %v1148_v10  ;;  %2991 = vmatprep.mubr.msk.f32.mxu1 %vm106_vm0, %v1159_v32  ;;  %v2751_v10 = vld [vmem:[%s3819_s5 + $0x1] ss:$0 sm:$0xff] }
 0xac6   :  { %v1160_v34 = vadd.f32 %v1158_v28, %v1154_v33 }
 0xac8   :  { %2992 = vmatmul.mubr.msk.f32.vlgmr.msra.gmra.mxu1 %vm106_vm0, %v1160_v34 }
 0xac9   :  { %3014 = vmatpush3.msra.mxu1 %v2731_v3 }
 0xaca   :  { %3015 = vmatprep.subr.mxu1 %v2730_v5 }
 0xacb   :  { %3016 = vmatpush3.msra.mxu1 %v2730_v5 }
 0xacc   :  { %3017 = vmatprep.subr.mxu1 %v2729_v2 }
 0xacd   :  { %3018 = vmatpush3.msra.mxu1 %v2729_v2 }
 0xace   :  { %3019 = vmatprep.subr.mxu1 %v2728_v4 }
 0xacf   :  { %3020 = vmatpush3.msra.mxu1 %v2728_v4 }
 0xb88   :  { %v2993_v40 = vpop.f32.mrf.mxu1 }
 0xb89   :  { %v1245_v41 = vadd.f32 %v2993_v40, %v2723_v39 }
 0xb8a   :  { %v1239_v42 = vpop.f32.mrf.mxu1 }
 0xb8b   :  { %v1240_v43 = vadd.f32 %v2723_v39, %v1239_v42  ;;  %v1249_v45 = vmax.f32 %v1245_v41, 0.0 }
 0xb8d   :  { %v1248_v44 = vmax.f32 %v1240_v43, 0.0 }
 0xb8f   :  { %3010 = vmatprep.mubr.msk.f32.mxu0 %vm1254_vm6, %v1248_v44 }
 0xb90   :  { %3011 = vmatmul.mubr.msk.f32.vlgmr.msra.gmra.mxu0 %vm1254_vm6, %v1249_v45 }
 0xc50   :  { %v3012_v48 = vpop.f32.mrf.mxu0 }
 0xc51   :  { %v1333_v24 = vadd.f32 %v3012_v48, %v1253_v47 }
 0xc52   :  { %v1327_v50 = vpop.f32.mrf.mxu0 }
 0xc53   :  { %v1328_v51 = vadd.f32 %v1327_v50, %v1253_v47  ;;  %v1337_v52 = vadd.f32 %v1333_v24, %v1160_v34 }
 0xc55   :  { %v1341_v53 = vsel %vm106_vm0, %v1337_v52, 0.0  ;;  %v1336_v54 = vadd.f32 %v1328_v51, %v1159_v32 }
 0xc56   :  { %1342 = vadd.xlane.f32.xlu0 %v1341_v53 }
 0xc57   :  { %v1338_v55 = vsel %vm106_vm0, %v1336_v54, 0.0 }
 0xc58   :  { %1339 = vadd.xlane.f32.xlu1 %v1338_v55 }
 0xcdf   :  { %v1343_v56 = vpop.xlane.xlu0 %1342 }
 0xce0   :  { %v1345_v57 = vmul.f32 0.03125, %v1343_v56 }
 0xce1   :  { %v1340_v58 = vpop.xlane.xlu1 %1339 }
 0xce2   :  { %v1347_v59 = vsub.f32 %v1337_v52, %v1345_v57  ;;  %v1344_v60 = vmul.f32 0.03125, %v1340_v58 }
 0xce4   :  { %v1346_v61 = vsub.f32 %v1336_v54, %v1344_v60  ;;  %v1349_v62 = vmul.f32 %v1347_v59, %v1347_v59 }
 0xce6   :  { %v1353_v63 = vsel %vm106_vm0, %v1349_v62, 0.0  ;;  %v1348_v0 = vmul.f32 %v1346_v61, %v1346_v61 }
 0xce7   :  { %1354 = vadd.xlane.f32.xlu0 %v1353_v63 }
 0xce8   :  { %v1350_v1 = vsel %vm106_vm0, %v1348_v0, 0.0 }
 0xce9   :  { %1351 = vadd.xlane.f32.xlu1 %v1350_v1 }
 0xd70   :  { %v1355_v6 = vpop.xlane.xlu0 %1354 }
 0xd71   :  { %v1357_v7 = vmul.f32 0.03125, %v1355_v6 }
 0xd72   :  { %v1352_v9 = vpop.xlane.xlu1 %1351 }
 0xd73   :  { %v1359_v11 = vadd.f32 1e-05, %v1357_v7  ;;  %v1356_v12 = vmul.f32 0.03125, %v1352_v9 }
 0xd75   :  { %3174 = vrsqrt.f32 %v1359_v11  ;;  %v1358_v13 = vadd.f32 1e-05, %v1356_v12 }
 0xd77   :  { %3176 = vrsqrt.f32 %v1358_v13 }
 0xd82   :  { %v3175_v15 = vpop.eup %3174 }
 0xd83   :  { %v1363_v17 = vmul.f32 %v3175_v15, %v1347_v59 }
 0xd84   :  { %v3177_v19 = vpop.eup %3176 }
 0xd85   :  { %v1362_v22 = vmul.f32 %v3177_v19, %v1346_v61  ;;  %v1369_v23 = vmul.f32 %v1367_v16, %v1363_v17 }
 0xd87   :  { %v1368_v28 = vmul.f32 %v1367_v16, %v1362_v22  ;;  %v3579_v31 = vadd.f32 %v1373_v27, %v1369_v23 }
 0xd89   :  { %v3577_v30 = vadd.f32 %v1373_v27, %v1368_v28 }
 0xd8b   :  { %3021 = vmatprep.mubr.msk.f32.mxu1 %vm106_vm0, %v3577_v30 }
 0xd8c   :  { %3022 = vmatmul.mubr.msk.f32.vlgmr.msra.gmra.mxu1 %vm106_vm0, %v3579_v31 }
 0xe4c   :  { %v3023_v32 = vpop.f32.mrf.mxu1 }
 0xe4d   :  { %v3588_v33 = vadd.f32 %v3023_v32, %v2751_v10 }
 0xe4e   :  { %v1484_v34 = vpop.f32.mrf.mxu1 }
 0xe4f   :  { %v3590_v49 = vadd.f32 %v2751_v10, %v1484_v34  ;;  %1497 = vrot.lane.b32.xlu1 %v3588_v33, %s3241_s0 }
 0xe51   :  { %1495 = vrot.lane.b32.xlu0 %v3590_v49, %s3241_s0  ;;  %3028 = vmatprep.mubr.msk.f32.mxu1 %vm194_vm1, %v3590_v49 }
 0xe53   :  { %1701 = vrot.lane.b32.xlu1 %v3588_v33, %s3240_s19 }
 0xe55   :  { %1695 = vrot.lane.b32.xlu0 %v3590_v49, %s3242_s20 }
 0xe57   :  { %1699 = vrot.lane.b32.xlu1 %v3590_v49, %s3240_s19 }
 0xe5b   :  { %1697 = vrot.lane.b32.xlu1 %v3588_v33, %s3242_s20 }
 0xec1   :  { %v1498_v35 = vpop.permute.xlu1 %1497 }
 0xec2   :  { %3024 = vmatprep.subr.msk.mxu1 %vm194_vm1, %v1498_v35 }
 0xec3   :  { %3025 = vmatpush3.xpose.msk.msra.mxu1 %vm194_vm1, %v1498_v35  ;;  %v1496_v36 = vpop.permute.xlu0 %1495 }
 0xec4   :  { %3026 = vmatprep.subr.msk.mxu1 %vm194_vm1, %v1496_v36 }
 0xec5   :  { %v1702_v37 = vpop.permute.xlu1 %1701 }
 0xec7   :  { %3027 = vmatpush3.xpose.msk.msra.mxu1 %vm194_vm1, %v1496_v36  ;;  %v1696_v38 = vpop.permute.xlu0 %1695 }
 0xec8   :  { %3038 = vmatprep.subr.msk.mxu1 %vm194_vm1, %v1702_v37 }
 0xec9   :  { %v1700_v39 = vpop.permute.xlu1 %1699 }
 0xeca   :  { %3029 = vmatmul.mubr.msk.f32.vlgmr.msra.gmra.mxu1 %vm194_vm1, %v3588_v33 }
 0xecb   :  { %3039 = vmatpush3.xpose.msk.msra.mxu1 %vm194_vm1, %v1702_v37  ;;  %3042 = vmatprep.mubr.msk.f32.mxu1 %vm194_vm1, %v1696_v38 }
 0xecc   :  { %3040 = vmatprep.subr.msk.mxu1 %vm194_vm1, %v1700_v39 }
 0xecd   :  { %v1698_v40 = vpop.permute.xlu1 %1697 }
 0xecf   :  { %3041 = vmatpush3.xpose.msk.msra.mxu1 %vm194_vm1, %v1700_v39 }
 0xed2   :  { %3043 = vmatmul.mubr.msk.f32.vlgmr.msra.gmra.mxu1 %vm194_vm1, %v1698_v40 }
 0xf8a   :  { %v3030_v41 = vpop.f32.mrf.mxu1 }
 0xf8b   :  { %v1583_v42 = vmul.f32 0.35355338, %v3030_v41 }
 0xf8c   :  { %v1573_v43 = vpop.f32.mrf.mxu1 }
 0xf8d   :  { %v1582_v44 = vmul.f32 0.35355338, %v1573_v43  ;;  %v1585_v45 = vadd.f32 %v1583_v42, %v3365_v26 }
 0xf8f   :  { %v1589_v47 = vsel %vm282_vm4, %v1585_v45, -inf  ;;  %v1584_v48 = vadd.f32 %v1582_v44, %v3367_v29 }
 0xf90   :  { %1590 = vmax.xlane.f32.xlu1 %v1589_v47 }
 0xf91   :  { %v1586_v24 = vsel %vm282_vm4, %v1584_v48, -inf }
 0xf92   :  { %v3044_v50 = vpop.f32.mrf.mxu1  ;;  %1587 = vmax.xlane.f32.xlu0 %v1586_v24 }
 0xf93   :  { %v1787_v52 = vmul.f32 0.35355338, %v3044_v50 }
 0xf94   :  { %v1777_v51 = vpop.f32.mrf.mxu1 }
 0xf95   :  { %v1786_v53 = vmul.f32 0.35355338, %v1777_v51  ;;  %v1789_v56 = vadd.f32 %v1787_v52, %v3365_v26 }
 0xf97   :  { %v1788_v54 = vadd.f32 %v1786_v53, %v3367_v29  ;;  %v1793_v57 = vsel %vm282_vm4, %v1789_v56, -inf }
 0xf99   :  { %v1790_v55 = vsel %vm282_vm4, %v1788_v54, -inf }
 0xf9a   :  { %1791 = vmax.xlane.f32.xlu0 %v1790_v55 }
 0xf9e   :  { %1794 = vmax.xlane.f32.xlu0 %v1793_v57 }
 0xfa1   :  { %1610 = vrot.lane.b32.xlu1 %v3588_v33, %s3244_s21 }
 0xfa5   :  { %1814 = vrot.lane.b32.xlu1 %v3588_v33, %s3245_s22 }
 0xfa9   :  { %1812 = vrot.lane.b32.xlu1 %v3590_v49, %s3245_s22 }
 0xfb4   :  { %1608 = vrot.lane.b32.xlu0 %v3590_v49, %s3244_s21 }
0x1019   :  { %v1591_v58 = vpop.xlane.xlu1 %1590 }
0x101a   :  { %v1593_v59 = vsub.f32 %v1585_v45, %v1591_v58 }
0x101b   :  { %v1588_v60 = vpop.xlane.xlu0 %1587 }
0x101c   :  { %v1596_v61 = vmul.f32 1.442695, %v1593_v59  ;;  %v1592_v62 = vsub.f32 %v1584_v48, %v1588_v60 }
0x101d   :  { %v1611_v63 = vpop.permute.xlu1 %1610 }
0x101e   :  { %3178 = vpow2.f32 %v1596_v61  ;;  %v1594_v0 = vmul.f32 1.442695, %v1592_v62  ;;  %3031 = vmatprep.subr.mxu0 %v1611_v63 }
0x101f   :  { %3032 = vmatpush3.msra.mxu0 %v1611_v63 }
0x1020   :  { %3180 = vpow2.f32 %v1594_v0 }
0x1021   :  { %v1815_v11 = vpop.permute.xlu1 %1814 }
0x1023   :  { %v1792_v1 = vpop.xlane.xlu0 %1791 }
0x1024   :  { %v1796_v16 = vsub.f32 %v1788_v54, %v1792_v1 }
0x1025   :  { %v1813_v23 = vpop.permute.xlu1 %1812 }
0x1026   :  { %v1798_v17 = vmul.f32 1.442695, %v1796_v16 }
0x1027   :  { %v1795_v3 = vpop.xlane.xlu0 %1794 }
0x1028   :  { %v1797_v5 = vsub.f32 %v1789_v56, %v1795_v3 }
0x102a   :  { %v1800_v2 = vmul.f32 1.442695, %v1797_v5 }
0x102b   :  { %v3179_v4 = vpop.eup %3178  ;;  %v1609_v6 = vpop.permute.xlu0 %1608 }
0x102c   :  { %3182 = vpow2.f32 %v1800_v2  ;;  %3033 = vmatprep.subr.mxu0 %v1609_v6  ;;  %v1601_v7 = vsel %vm282_vm4, %v3179_v4, 0.0 }
0x102d   :  { %v3181_v9 = vpop.eup %3180  ;;  %1602 = vadd.xlane.f32.xlu0 %v1601_v7  ;;  %3034 = vmatpush3.msra.mxu0 %v1609_v6  ;;  %3184 = vpow2.f32 %v1798_v17 }
0x102e   :  { %3045 = vmatprep.subr.mxu0 %v1815_v11  ;;  %v1598_v12 = vsel %vm282_vm4, %v3181_v9, 0.0 }
0x102f   :  { %1599 = vadd.xlane.f32.xlu1 %v1598_v12 }
0x1039   :  { %v3183_v13 = vpop.eup %3182 }
0x103a   :  { %v1805_v15 = vsel %vm282_vm4, %v3183_v13, 0.0  ;;  %v3185_v19 = vpop.eup %3184 }
0x103b   :  { %1806 = vadd.xlane.f32.xlu0 %v1805_v15  ;;  %v1802_v22 = vsel %vm282_vm4, %v3185_v19, 0.0 }
0x1040   :  { %1903 = vrot.lane.b32.xlu1 %v3590_v49, %s3246_s23 }
0x1051   :  { %1905 = vrot.lane.b32.xlu0 %v3588_v33, %s3246_s23 }
0x1055   :  { %1899 = vrot.lane.b32.xlu0 %v3590_v49, %s3247_s24 }
0x1064   :  { %1803 = vadd.xlane.f32.xlu1 %v1802_v22 }
0x1075   :  { %1901 = vrot.lane.b32.xlu1 %v3588_v33, %s3247_s24 }
0x10b6   :  { %v1603_v27 = vpop.xlane.xlu0 %1602 }
0x10b7   :  { %3186 = vrcp.f32 %v1603_v27 }
0x10b8   :  { %v1600_v28 = vpop.xlane.xlu1 %1599 }
0x10b9   :  { %3188 = vrcp.f32 %v1600_v28 }
0x10bc   :  { %v1904_v38 = vpop.permute.xlu1 %1903 }
0x10c4   :  { %v3187_v10 = vpop.eup %3186  ;;  %v1807_v34 = vpop.xlane.xlu0 %1806 }
0x10c5   :  { %v1607_v36 = vmul.f32 %v3187_v10, %v3179_v4  ;;  %3190 = vrcp.f32 %v1807_v34 }
0x10c6   :  { %v3189_v32 = vpop.eup %3188 }
0x10c7   :  { %v1605_v35 = vmul.f32 %v3189_v32, %v3181_v9 }
0x10c8   :  { %v1906_v37 = vpop.permute.xlu0 %1905 }
0x10c9   :  { %3035 = vmatprep.mubr.msk.f32.mxu0 %vm282_vm4, %v1605_v35 }
0x10ca   :  { %3036 = vmatmul.mubr.msk.f32.vlgmr.msra.gmra.mxu0 %vm282_vm4, %v1607_v36 }
0x10cb   :  { %3046 = vmatpush3.msra.mxu0 %v1815_v11 }
0x10cc   :  { %3047 = vmatprep.subr.mxu0 %v1813_v23  ;;  %v1900_v44 = vpop.permute.xlu0 %1899 }
0x10cd   :  { %3048 = vmatpush3.msra.mxu0 %v1813_v23 }
0x10ce   :  { %3052 = vmatprep.subr.msk.mxu0 %vm194_vm1, %v1906_v37 }
0x10d2   :  { %v3191_v40 = vpop.eup %3190 }
0x10d3   :  { %v1811_v43 = vmul.f32 %v3191_v40, %v3183_v13 }
0x10ed   :  { %v1804_v39 = vpop.xlane.xlu1 %1803 }
0x10ee   :  { %3192 = vrcp.f32 %v1804_v39 }
0x10f1   :  { %v1902_v45 = vpop.permute.xlu1 %1901 }
0x10fb   :  { %v3193_v41 = vpop.eup %3192 }
0x10fc   :  { %v1809_v42 = vmul.f32 %v3193_v41, %v3185_v19 }
0x10fe   :  { %3049 = vmatprep.mubr.msk.f32.mxu0 %vm282_vm4, %v1809_v42 }
0x10ff   :  { %3050 = vmatmul.mubr.msk.f32.vlgmr.msra.gmra.mxu0 %vm282_vm4, %v1811_v43 }
0x1100   :  { %3053 = vmatpush3.xpose.msk.msra.mxu0 %vm194_vm1, %v1906_v37  ;;  %3056 = vmatprep.mubr.msk.f32.mxu0 %vm194_vm1, %v1900_v44 }
0x1101   :  { %3054 = vmatprep.subr.msk.mxu0 %vm194_vm1, %v1904_v38 }
0x1104   :  { %3055 = vmatpush3.xpose.msk.msra.mxu0 %vm194_vm1, %v1904_v38 }
0x1107   :  { %3057 = vmatmul.mubr.msk.f32.vlgmr.msra.gmra.mxu0 %vm194_vm1, %v1902_v45 }
0x118a   :  { %v3656_v47 = vpop.f32.mrf.mxu0 }
0x118c   :  { %v3658_v48 = vpop.f32.mrf.mxu0 }
0x11bf   :  { %v3660_v24 = vpop.f32.mrf.mxu0 }
0x11c1   :  { %v3662_v50 = vpop.f32.mrf.mxu0 }
0x11c7   :  { %v3058_v51 = vpop.f32.mrf.mxu0 }
0x11c8   :  { %v1991_v52 = vmul.f32 0.35355338, %v3058_v51 }
0x11c9   :  { %v1981_v53 = vpop.f32.mrf.mxu0 }
0x11ca   :  { %v1990_v54 = vmul.f32 0.35355338, %v1981_v53  ;;  %v1993_v55 = vadd.f32 %v1991_v52, %v3365_v26 }
0x11cc   :  { %v1997_v56 = vsel %vm282_vm4, %v1993_v55, -inf  ;;  %v1992_v57 = vadd.f32 %v1990_v54, %v3367_v29 }
0x11cd   :  { %1998 = vmax.xlane.f32.xlu1 %v1997_v56 }
0x11ce   :  { %v1994_v58 = vsel %vm282_vm4, %v1992_v57, -inf }
0x11cf   :  { %1995 = vmax.xlane.f32.xlu0 %v1994_v58  ;;  %v2733_v58 = vld [vmem:[%s3816_s2 + $0x28] sm:$0xff] }
0x11de   :  { %2018 = vrot.lane.b32.xlu1 %v3588_v33, %s3248_s25 }
0x11e2   :  { %2109 = vrot.lane.b32.xlu1 %v3588_v33, %s3249_s26 }
0x11e6   :  { %2107 = vrot.lane.b32.xlu1 %v3590_v49, %s3249_s26 }
0x11ea   :  { %2105 = vrot.lane.b32.xlu1 %v3588_v33, %s3250_s27 }
0x1256   :  { %v1999_v59 = vpop.xlane.xlu1 %1998 }
0x1257   :  { %v2001_v60 = vsub.f32 %v1993_v55, %v1999_v59  ;;  %v2732_v59 = vld [vmem:[%s3816_s2 + $0x20] sm:$0xff] }
0x1258   :  { %v1996_v61 = vpop.xlane.xlu0 %1995 }
0x1259   :  { %v2004_v62 = vmul.f32 1.442695, %v2001_v60  ;;  %v2000_v63 = vsub.f32 %v1992_v57, %v1996_v61  ;;  %v2734_v57 = vld [vmem:[%s3816_s2 + $0x30] sm:$0xff] }
0x125a   :  { %v2019_v0 = vpop.permute.xlu1 %2018 }
0x125b   :  { %3194 = vpow2.f32 %v2004_v62  ;;  %v2002_v1 = vmul.f32 1.442695, %v2000_v63  ;;  %3059 = vmatprep.subr.mxu1 %v2019_v0 }
0x125c   :  { %3060 = vmatpush3.msra.mxu1 %v2019_v0 }
0x125d   :  { %3196 = vpow2.f32 %v2002_v1 }
0x125e   :  { %v2110_v11 = vpop.permute.xlu1 %2109 }
0x1262   :  { %v2108_v19 = vpop.permute.xlu1 %2107 }
0x1266   :  { %v2106_v22 = vpop.permute.xlu1 %2105 }
0x1268   :  { %v3195_v3 = vpop.eup %3194 }
0x1269   :  { %v2009_v5 = vsel %vm282_vm4, %v3195_v3, 0.0 }
0x126a   :  { %v3197_v2 = vpop.eup %3196  ;;  %2010 = vadd.xlane.f32.xlu0 %v2009_v5 }
0x126b   :  { %v2006_v4 = vsel %vm282_vm4, %v3197_v2, 0.0 }
0x126e   :  { %2007 = vadd.xlane.f32.xlu0 %v2006_v4 }
0x1284   :  { %2016 = vrot.lane.b32.xlu0 %v3590_v49, %s3248_s25 }
0x1288   :  { %2103 = vrot.lane.b32.xlu0 %v3590_v49, %s3250_s27 }
0x12f3   :  { %v2011_v6 = vpop.xlane.xlu0 %2010 }
0x12f4   :  { %3198 = vrcp.f32 %v2011_v6 }
0x12f7   :  { %v2008_v7 = vpop.xlane.xlu0 %2007 }
0x12f8   :  { %3200 = vrcp.f32 %v2008_v7 }
0x12fb   :  { %v2017_v9 = vpop.permute.xlu0 %2016 }
0x12fc   :  { %3061 = vmatprep.subr.mxu1 %v2017_v9 }
0x12fd   :  { %3062 = vmatpush3.msra.mxu1 %v2017_v9 }
0x12fe   :  { %3066 = vmatprep.subr.msk.mxu1 %vm194_vm1, %v2110_v11 }
0x12ff   :  { %v2104_v17 = vpop.permute.xlu0 %2103 }
0x1301   :  { %v3199_v12 = vpop.eup %3198 }
0x1302   :  { %v2015_v16 = vmul.f32 %v3199_v12, %v3195_v3 }
0x1305   :  { %v3201_v13 = vpop.eup %3200 }
0x1306   :  { %v2013_v15 = vmul.f32 %v3201_v13, %v3197_v2 }
0x1308   :  { %3063 = vmatprep.mubr.msk.f32.mxu1 %vm282_vm4, %v2013_v15 }
0x1309   :  { %3064 = vmatmul.mubr.msk.f32.vlgmr.msra.gmra.mxu1 %vm282_vm4, %v2015_v16 }
0x130a   :  { %3067 = vmatpush3.xpose.msk.msra.mxu1 %vm194_vm1, %v2110_v11  ;;  %3070 = vmatprep.mubr.msk.f32.mxu1 %vm194_vm1, %v2104_v17 }
0x130b   :  { %3068 = vmatprep.subr.msk.mxu1 %vm194_vm1, %v2108_v19 }
0x130e   :  { %3069 = vmatpush3.xpose.msk.msra.mxu1 %vm194_vm1, %v2108_v19 }
0x1311   :  { %3071 = vmatmul.mubr.msk.f32.vlgmr.msra.gmra.mxu1 %vm194_vm1, %v2106_v22 }
0x13c9   :  { %v3065_v23 = vpop.f32.mrf.mxu1 }
0x13cb   :  { %v2094_v27 = vpop.f32.mrf.mxu1 }
0x13d1   :  { %v3072_v28 = vpop.f32.mrf.mxu1 }
0x13d2   :  { %v2195_v10 = vmul.f32 0.35355338, %v3072_v28 }
0x13d3   :  { %v2185_v32 = vpop.f32.mrf.mxu1 }
0x13d4   :  { %v2194_v34 = vmul.f32 0.35355338, %v2185_v32  ;;  %v2197_v35 = vadd.f32 %v2195_v10, %v3365_v26 }
0x13d6   :  { %v2201_v36 = vsel %vm282_vm4, %v2197_v35, -inf  ;;  %v2196_v37 = vadd.f32 %v2194_v34, %v3367_v29 }
0x13d7   :  { %2202 = vmax.xlane.f32.xlu1 %v2201_v36 }
0x13d8   :  { %v2198_v38 = vsel %vm282_vm4, %v2196_v37, -inf }
0x13d9   :  { %2199 = vmax.xlane.f32.xlu0 %v2198_v38  ;;  %v2738_v38 = vld [vmem:[%s3817_s3 + $0x30] sm:$0xff] }
0x13e8   :  { %2222 = vrot.lane.b32.xlu1 %v3588_v33, %s3251_s28 }
0x13ec   :  { %2309 = vrot.lane.b32.xlu1 %v3662_v50, %s3252_s29 }
0x13f0   :  { %2311 = vrot.lane.b32.xlu1 %v3660_v24, %s3252_s29 }
0x13f4   :  { %2319 = vrot.lane.b32.xlu1 %v3065_v23, %s3253_s30 }
0x1460   :  { %v2203_v26 = vpop.xlane.xlu1 %2202 }
0x1461   :  { %v2205_v39 = vsub.f32 %v2197_v35, %v2203_v26  ;;  %v2737_v26 = vld [vmem:[%s3817_s3 + $0x28] sm:$0xff] }
0x1462   :  { %v2200_v40 = vpop.xlane.xlu0 %2199 }
0x1463   :  { %v2208_v41 = vmul.f32 1.442695, %v2205_v39  ;;  %v2204_v29 = vsub.f32 %v2196_v37, %v2200_v40  ;;  %v2736_v39 = vld [vmem:[%s3817_s3 + $0x20] sm:$0xff]  ;;  %v2747_v40 = vld [vmem:[%s3818_s4 + $0x78] sm:$0xff] }
0x1464   :  { %v2223_v42 = vpop.permute.xlu1 %2222 }
0x1465   :  { %3202 = vpow2.f32 %v2208_v41  ;;  %v2206_v43 = vmul.f32 1.442695, %v2204_v29  ;;  %3073 = vmatprep.subr.mxu0 %v2223_v42  ;;  %v2746_v41 = vld [vmem:[%s3818_s4 + $0x70] sm:$0xff]  ;;  %v2745_v29 = vld [vmem:[%s3818_s4 + $0x68] sm:$0xff] }
0x1466   :  { %3074 = vmatpush3.msra.mxu0 %v2223_v42  ;;  %v2744_v42 = vld [vmem:[%s3818_s4 + $0x60] sm:$0xff] }
0x1467   :  { %3204 = vpow2.f32 %v2206_v43 }
0x1468   :  { %v2310_v62 = vpop.permute.xlu1 %2309 }
0x1469   :  { %v2331_v3 = vsel %vm194_vm1, %v3658_v48, %v2310_v62  ;;  %v3735_v48 = vld [vmem:[%s3821_s7 + $0x8] sm:$0x3f]  ;;  %v2780_v62 = vld [vmem:[%s3820_s6 + $0x1] ss:$0 sm:$0xff] }
0x146c   :  { %v2312_v63 = vpop.permute.xlu1 %2311 }
0x146d   :  { %v2332_v2 = vsel %vm194_vm1, %v3656_v47, %v2312_v63  ;;  %v2340_v47 = vrot.slane %v3735_v48, %v1037_v25 }
0x1470   :  { %v2320_v0 = vpop.permute.xlu1 %2319 }
0x1471   :  { %v2334_v7 = vsel %vm282_vm4, %v2332_v2, %v2320_v0 }
0x1472   :  { %v3203_v33 = vpop.eup %3202 }
0x1473   :  { %v2213_v44 = vsel %vm282_vm4, %v3203_v33, 0.0 }
0x1474   :  { %v3205_v45 = vpop.eup %3204  ;;  %2214 = vadd.xlane.f32.xlu0 %v2213_v44 }
0x1475   :  { %v2210_v24 = vsel %vm282_vm4, %v3205_v45, 0.0 }
0x1478   :  { %2211 = vadd.xlane.f32.xlu0 %v2210_v24 }
0x148e   :  { %2220 = vrot.lane.b32.xlu0 %v3590_v49, %s3251_s28  ;;  %v2735_v49 = vld [vmem:[%s3816_s2 + $0x38] sm:$0xff] }
0x1492   :  { %2317 = vrot.lane.b32.xlu0 %v2094_v27, %s3253_s30 }
0x14fd   :  { %v2215_v50 = vpop.xlane.xlu0 %2214 }
0x14fe   :  { %3206 = vrcp.f32 %v2215_v50 }
0x1501   :  { %v2212_v51 = vpop.xlane.xlu0 %2211 }
0x1502   :  { %3208 = vrcp.f32 %v2212_v51  ;;  %v2453_v51 = vrot.slane %v3735_v48, %v1151_v20  ;;  %v2743_v20 = vld [vmem:[%s3818_s4 + $0x58] sm:$0xff] }
0x1505   :  { %v2221_v52 = vpop.permute.xlu0 %2220 }
0x1506   :  { %3075 = vmatprep.subr.mxu0 %v2221_v52 }
0x1507   :  { %3076 = vmatpush3.msra.mxu0 %v2221_v52 }
0x1508   :  { %3080 = vmatprep.subr.mxu0 %v2735_v49 }
0x1509   :  { %v2318_v1 = vpop.permute.xlu0 %2317 }
0x150a   :  { %v2333_v4 = vsel %vm282_vm4, %v2331_v3, %v2318_v1 }
0x150b   :  { %v3207_v53 = vpop.eup %3206 }
0x150c   :  { %v2219_v56 = vmul.f32 %v3207_v53, %v3203_v33 }
0x150f   :  { %v3209_v54 = vpop.eup %3208 }
0x1510   :  { %v2217_v55 = vmul.f32 %v3209_v54, %v3205_v45  ;;  %v2459_v54 = vrot.slane %v3735_v48, %v1157_v21  ;;  %v2742_v21 = vld [vmem:[%s3818_s4 + $0x50] sm:$0xff] }
0x1512   :  { %3077 = vmatprep.mubr.msk.f32.mxu0 %vm282_vm4, %v2217_v55 }
0x1513   :  { %3078 = vmatmul.mubr.msk.f32.vlgmr.msra.gmra.mxu0 %vm282_vm4, %v2219_v56 }
0x1514   :  { %3081 = vmatpush3.msra.mxu0 %v2735_v49 }
0x1515   :  { %3082 = vmatprep.subr.mxu0 %v2734_v57 }
0x1516   :  { %3083 = vmatpush3.msra.mxu0 %v2734_v57 }
0x1517   :  { %3084 = vmatprep.subr.mxu0 %v2733_v58 }
0x1518   :  { %3085 = vmatpush3.msra.mxu0 %v2733_v58 }
0x1519   :  { %3086 = vmatprep.subr.mxu0 %v2732_v59 }
0x151a   :  { %3087 = vmatpush3.msra.mxu0 %v2732_v59 }
0x151b   :  { %3102 = vmatprep.subr.mxu0 %v2747_v40 }
0x15d3   :  { %v3079_v60 = vpop.f32.mrf.mxu0 }
0x15d4   :  { %2327 = vrot.lane.b32.xlu1 %v3079_v60, %s3254_s17  ;;  %v2741_v60 = vld [vmem:[%s3818_s4 + $0x48] sm:$0xff] }
0x15d5   :  { %v2298_v61 = vpop.f32.mrf.mxu0 }
0x15d6   :  { %2325 = vrot.lane.b32.xlu0 %v2298_v61, %s3254_s17  ;;  %v2740_v61 = vld [vmem:[%s3818_s4 + $0x40] sm:$0xff]  ;;  %s3255_s4 = smov [#allocation2]  }
0x15d7   :  { %s2683_s6 = sshll.u32 %s3255_s4, 4  ;;  %s2684_s6 = int_to_ptr.vmem [resolvable:$true] %s2683_s6 }
0x15d8   :  { %s3218_s25 = scalar_lea.vmem %s2684_s6, 256  ;;  %p3223_p1 = scmp.lt.s32.totalorder %s2684_s6, %s2684_s6 }
0x15d9   :  { %p3219_p0 = scmp.ne.s32.totalorder %s2684_s6, %s3218_s25  ;;  %p3224_p2 = scmp.lt.s32.totalorder %s3218_s25, %s3218_s25 }
0x15db   :  { %p3225_p3 = por %p3224_p2, %p3223_p1 }
0x15dd   :  { %p3226_p4 = pnand %p3225_p3, %p3219_p0 }
0x1646   :  { %v2328_v5 = vpop.permute.xlu1 %2327 }
0x1647   :  { %v2336_v11 = vsel %vm1032_vm5, %v2334_v7, %v2328_v5 }
0x1648   :  { %v2326_v6 = vpop.permute.xlu0 %2325 }
0x1649   :  { %v2335_v9 = vsel %vm1032_vm5, %v2333_v4, %v2326_v6  ;;  %v2554_v4 = vrot.slane %v3735_v48, %v1252_v46 }
0x164a   :  { %3088 = vmatprep.mubr.msk.f32.mxu0 %vm106_vm0, %v2335_v9 }
0x164b   :  { %3089 = vmatmul.mubr.msk.f32.vlgmr.msra.gmra.mxu0 %vm106_vm0, %v2336_v11 }
0x164c   :  { %3103 = vmatpush3.msra.mxu0 %v2747_v40 }
0x164d   :  { %3104 = vmatprep.subr.mxu0 %v2746_v41 }
0x164e   :  { %3105 = vmatpush3.msra.mxu0 %v2746_v41 }
0x164f   :  { %3106 = vmatprep.subr.mxu0 %v2745_v29 }
0x1650   :  { %3107 = vmatpush3.msra.mxu0 %v2745_v29 }
0x1651   :  { %3108 = vmatprep.subr.mxu0 %v2744_v42 }
0x1652   :  { %3109 = vmatpush3.msra.mxu0 %v2744_v42 }
0x1653   :  { %3110 = vmatprep.subr.mxu0 %v2743_v20 }
0x1654   :  { %3111 = vmatpush3.msra.mxu0 %v2743_v20 }
0x1655   :  { %3112 = vmatprep.subr.mxu0 %v2742_v21 }
0x1656   :  { %3113 = vmatpush3.msra.mxu0 %v2742_v21 }
0x1657   :  { %3114 = vmatprep.subr.mxu0 %v2741_v60 }
0x1658   :  { %3115 = vmatpush3.msra.mxu0 %v2741_v60 }
0x1659   :  { %3116 = vmatprep.subr.mxu0 %v2740_v61 }
0x165a   :  { %3117 = vmatpush3.msra.mxu0 %v2740_v61 }
0x170b   :  { %v3090_v12 = vpop.f32.mrf.mxu0 }
0x170c   :  { %v2419_v13 = vadd.f32 %v3090_v12, %v2340_v47 }
0x170d   :  { %v2413_v15 = vpop.f32.mrf.mxu0 }
0x170e   :  { %v2414_v16 = vadd.f32 %v2413_v15, %v2340_v47  ;;  %v2423_v17 = vadd.f32 %v2419_v13, %v3579_v31 }
0x1710   :  { %v2427_v19 = vsel %vm106_vm0, %v2423_v17, 0.0  ;;  %v2422_v22 = vadd.f32 %v2414_v16, %v3577_v30  ;;  %v2739_v30 = vld [vmem:[%s3817_s3 + $0x38] sm:$0xff] }
0x1711   :  { %2428 = vadd.xlane.f32.xlu1 %v2427_v19  ;;  %3091 = vmatprep.subr.mxu1 %v2739_v30 }
0x1712   :  { %v2424_v23 = vsel %vm106_vm0, %v2422_v22, 0.0  ;;  %3092 = vmatpush3.msra.mxu1 %v2739_v30  ;;  %v2667_v30 = vrot.slane %v3735_v48, %v1366_v14 }
0x1713   :  { %2425 = vadd.xlane.f32.xlu0 %v2424_v23  ;;  %3093 = vmatprep.subr.mxu1 %v2738_v38 }
0x1714   :  { %3094 = vmatpush3.msra.mxu1 %v2738_v38 }
0x1715   :  { %3095 = vmatprep.subr.mxu1 %v2737_v26 }
0x1716   :  { %3096 = vmatpush3.msra.mxu1 %v2737_v26 }
0x1717   :  { %3097 = vmatprep.subr.mxu1 %v2736_v39 }
0x1718   :  { %3098 = vmatpush3.msra.mxu1 %v2736_v39  ;;  %v2673_v39 = vrot.slane %v3735_v48, %v1372_v8 }
0x179a   :  { %v2429_v27 = vpop.xlane.xlu1 %2428 }
0x179b   :  { %v2431_v28 = vmul.f32 0.03125, %v2429_v27 }
0x179c   :  { %v2426_v10 = vpop.xlane.xlu0 %2425 }
0x179d   :  { %v2430_v32 = vmul.f32 0.03125, %v2426_v10  ;;  %v2433_v34 = vsub.f32 %v2423_v17, %v2431_v28 }
0x179f   :  { %v2432_v25 = vsub.f32 %v2422_v22, %v2430_v32  ;;  %v2435_v37 = vmul.f32 %v2433_v34, %v2433_v34 }
0x17a1   :  { %v2434_v35 = vmul.f32 %v2432_v25, %v2432_v25  ;;  %v2439_v31 = vsel %vm106_vm0, %v2435_v37, 0.0 }
0x17a3   :  { %v2436_v36 = vsel %vm106_vm0, %v2434_v35, 0.0 }
0x17a4   :  { %2437 = vadd.xlane.f32.xlu0 %v2436_v36 }
0x17a8   :  { %2440 = vadd.xlane.f32.xlu0 %v2439_v31 }
0x182d   :  { %v2438_v43 = vpop.xlane.xlu0 %2437 }
0x182e   :  { %v2442_v33 = vmul.f32 0.03125, %v2438_v43 }
0x1830   :  { %v2444_v44 = vadd.f32 1e-05, %v2442_v33 }
0x1831   :  { %v2441_v45 = vpop.xlane.xlu0 %2440 }
0x1832   :  { %3210 = vrsqrt.f32 %v2444_v44  ;;  %v2443_v24 = vmul.f32 0.03125, %v2441_v45 }
0x1834   :  { %v2445_v50 = vadd.f32 1e-05, %v2443_v24 }
0x1836   :  { %3212 = vrsqrt.f32 %v2445_v50 }
0x183f   :  { %v3211_v52 = vpop.eup %3210 }
0x1840   :  { %v2448_v53 = vmul.f32 %v3211_v52, %v2432_v25 }
0x1842   :  { %v2454_v55 = vmul.f32 %v2453_v51, %v2448_v53 }
0x1843   :  { %v3213_v56 = vpop.eup %3212 }
0x1844   :  { %v2449_v49 = vmul.f32 %v3213_v56, %v2433_v34  ;;  %v2460_v57 = vadd.f32 %v2459_v54, %v2454_v55 }
0x1846   :  { %v2455_v58 = vmul.f32 %v2453_v51, %v2449_v49  ;;  %3099 = vmatprep.mubr.msk.f32.mxu1 %vm106_vm0, %v2460_v57 }
0x1848   :  { %v2461_v59 = vadd.f32 %v2459_v54, %v2455_v58 }
0x184a   :  { %3100 = vmatmul.mubr.msk.f32.vlgmr.msra.gmra.mxu1 %vm106_vm0, %v2461_v59 }
0x190a   :  { %v3101_v63 = vpop.f32.mrf.mxu1 }
0x190b   :  { %v2546_v0 = vadd.f32 %v3101_v63, %v2780_v62 }
0x190c   :  { %v2540_v1 = vpop.f32.mrf.mxu1 }
0x190d   :  { %v2541_v3 = vadd.f32 %v2780_v62, %v2540_v1  ;;  %v2550_v2 = vmax.f32 %v2546_v0, 0.0 }
0x190f   :  { %v2549_v5 = vmax.f32 %v2541_v3, 0.0 }
0x1911   :  { %3118 = vmatprep.mubr.msk.f32.mxu0 %vm1254_vm6, %v2549_v5 }
0x1912   :  { %3119 = vmatmul.mubr.msk.f32.vlgmr.msra.gmra.mxu0 %vm1254_vm6, %v2550_v2 }
0x19d2   :  { %v3120_v6 = vpop.f32.mrf.mxu0 }
0x19d3   :  { %v2633_v7 = vadd.f32 %v3120_v6, %v2554_v4 }
0x19d4   :  { %v2627_v9 = vpop.f32.mrf.mxu0 }
0x19d5   :  { %v2637_v11 = vadd.f32 %v2633_v7, %v2461_v59  ;;  %v2628_v47 = vadd.f32 %v2627_v9, %v2554_v4 }
0x19d7   :  { %v2636_v12 = vadd.f32 %v2628_v47, %v2460_v57  ;;  %v2641_v13 = vsel %vm106_vm0, %v2637_v11, 0.0 }
0x19d8   :  { %2642 = vadd.xlane.f32.xlu0 %v2641_v13 }
0x19d9   :  { %v2638_v15 = vsel %vm106_vm0, %v2636_v12, 0.0 }
0x19da   :  { %2639 = vadd.xlane.f32.xlu1 %v2638_v15 }
0x1a61   :  { %v2643_v16 = vpop.xlane.xlu0 %2642 }
0x1a62   :  { %v2645_v17 = vmul.f32 0.03125, %v2643_v16 }
0x1a63   :  { %v2640_v19 = vpop.xlane.xlu1 %2639 }
0x1a64   :  { %v2647_v22 = vsub.f32 %v2637_v11, %v2645_v17  ;;  %v2644_v23 = vmul.f32 0.03125, %v2640_v19 }
0x1a66   :  { %v2646_v27 = vsub.f32 %v2636_v12, %v2644_v23  ;;  %v2649_v28 = vmul.f32 %v2647_v22, %v2647_v22 }
0x1a68   :  { %v2653_v46 = vsel %vm106_vm0, %v2649_v28, 0.0  ;;  %v2648_v10 = vmul.f32 %v2646_v27, %v2646_v27 }
0x1a69   :  { %2654 = vadd.xlane.f32.xlu0 %v2653_v46 }
0x1a6a   :  { %v2650_v32 = vsel %vm106_vm0, %v2648_v10, 0.0 }
0x1a6b   :  { %2651 = vadd.xlane.f32.xlu1 %v2650_v32 }
0x1af2   :  { %v2655_v34 = vpop.xlane.xlu0 %2654 }
0x1af3   :  { %v2657_v25 = vmul.f32 0.03125, %v2655_v34 }
0x1af4   :  { %v2652_v35 = vpop.xlane.xlu1 %2651 }
0x1af5   :  { %v2659_v36 = vadd.f32 1e-05, %v2657_v25  ;;  %v2656_v37 = vmul.f32 0.03125, %v2652_v35 }
0x1af7   :  { %3214 = vrsqrt.f32 %v2659_v36  ;;  %v2658_v31 = vadd.f32 1e-05, %v2656_v37 }
0x1af9   :  { %3216 = vrsqrt.f32 %v2658_v31 }
0x1b04   :  { %v3215_v38 = vpop.eup %3214 }
0x1b05   :  { %v2663_v26 = vmul.f32 %v3215_v38, %v2647_v22 }
0x1b06   :  { %v3217_v40 = vpop.eup %3216 }
0x1b07   :  { %v2662_v41 = vmul.f32 %v3217_v40, %v2646_v27  ;;  %v2669_v29 = vmul.f32 %v2667_v30, %v2663_v26 }
0x1b09   :  { %v2668_v42 = vmul.f32 %v2667_v30, %v2662_v41  ;;  %v2675_v43 = vadd.f32 %v2673_v39, %v2669_v29 }
0x1b0b   :  { %v2674_v33 = vadd.f32 %v2673_v39, %v2668_v42  ;;  %2677 = vst.msk [vmem:[#allocation2 + $0x8] sm:$0xff] %vm106_vm0, %v2675_v43 }
0x1b0d   :  { %2676 = vst.msk [vmem:[#allocation2] sm:$0xff] %vm106_vm0, %v2674_v33 }
0x1b0e   :  { %3229 = shalt.err (!%p3226_p4)
}
0x1b0f   :  { %s3256_s7 = smov 128  }
0x1b10   :  { %2689 = dma.vmem_to_hbm [thread:$0]  %s2684_s6, 256, %s3822_s8, [#allocation3], %s3256_s7, %s3256_s7, %s3252_s29  }
0x1b11   :  { %3238 = dma.done.wait [#allocation3], 256  }
0x1b12   :  { %3239 = vsyncadd [#allocation3], 4294967040 }
0x1b13   :  { %2693 = vsyncpa [#allocation3], 1 }

</bundles_post_ra>
